<compile_context>
chip_gen: v5e
topology: v5e:2x2
jax: 0.10.0
libtpu: 0.0.40
codegen_flags: <defaults>
</compile_context>

<pallas_src>
import jax
import jax.numpy as jnp
from jax.experimental import pallas as pl
from jax.experimental.pallas import tpu as pltpu


def _ameli_kernel(mention_ref, m_mask_ref, entity_ref, e_mask_ref, ent_mask_ref,
                  wm_ref, bm_ref, we_ref, be_ref,
                  w1_ref, b1_ref, w2row_ref, b2_ref,
                  small_ref, match_ref):
    # per-grid-step block shapes (Bb batch elements per step):
    #   mention_ref : (Bb, Lm, T)  bf16     m_mask_ref : (Bb, Lm, 1)  f32
    #   entity_ref  : (Bb, E, Le, T) bf16   e_mask_ref : (Bb, E, Le, 1) f32
    #   ent_mask_ref: (Bb, E, 1) f32
    #   wm/we : (T, D) bf16   bm/be/b1 : (1, D) f32   w1 : (D, D) f32
    #   w2row : (1, D) f32    b2 : (1,) f32 in SMEM
    #   small_ref : (Bb, 2, E) f32  (row 0 = match score, row 1 = logics)
    #   match_ref : (Bb, E, D) f32
    f32 = jnp.float32
    Bb, Lm, T = mention_ref.shape
    E = entity_ref.shape[1]
    Le = entity_ref.shape[2]
    D = wm_ref.shape[1]

    # ---------------- mention side: masked token-sum, then project ----------
    m = mention_ref[...].astype(f32)                            # (Bb, Lm, T)
    mmask = m_mask_ref[...]                                     # (Bb, Lm, 1)
    m_tok_sum = jnp.sum(m * mmask, axis=1)                      # (Bb, T)
    m_cnt = jnp.sum(mmask, axis=1)                              # (Bb, 1)
    m_proj = jnp.dot(m_tok_sum, wm_ref[...].astype(f32),
                     preferred_element_type=f32)                # (Bb, D)
    m_pool = (m_proj + m_cnt * bm_ref[...]) / (m_cnt + 1e-9)    # (Bb, D)

    # ---------------- entity side: masked token-sum, then project -----------
    ent = entity_ref[...].astype(f32)                           # (Bb, E, Le, T)
    emask = e_mask_ref[...]                                     # (Bb, E, Le, 1)
    e_tok_sum = jnp.sum(ent * emask, axis=2).reshape(Bb * E, T) # (Bb*E, T)
    e_cnt = jnp.sum(emask, axis=2).reshape(Bb * E, 1)           # (Bb*E, 1)
    e_proj = jnp.dot(e_tok_sum, we_ref[...].astype(f32),
                     preferred_element_type=f32)                # (Bb*E, D)
    e_pool = (e_proj + e_cnt * be_ref[...]) / (e_cnt + 1e-9)    # (Bb*E, D)

    # element-wise match vector per candidate (mean-pooled interaction)
    match = e_pool.reshape(Bb, E, D) * m_pool[:, None, :]       # (Bb, E, D)
    match_ref[...] = match.astype(match_ref.dtype)
    score = jnp.sum(match, axis=-1)                             # (Bb, E)

    # ---------------- Classifier: Linear(D,D) + ReLU + lane-reduced head ----
    h = jnp.maximum(
        jnp.dot(match.reshape(Bb * E, D), w1_ref[...],
                preferred_element_type=f32) + b1_ref[...], 0.0) # (Bb*E, D)
    logits = (jnp.sum(h * w2row_ref[...], axis=-1, keepdims=True)
              + b2_ref[0]).reshape(Bb, E)                       # (Bb, E)

    # ---------------- masked softmax over candidate entities ----------------
    cmask = ent_mask_ref[...][:, :, 0]                          # (Bb, E)
    valid = cmask > 0
    masked_logits = jnp.where(valid, logits, jnp.full_like(logits, -1e30))
    mx = jnp.max(masked_logits, axis=-1, keepdims=True)         # (Bb, 1)
    p = jnp.exp(masked_logits - mx) * valid.astype(f32)         # (Bb, E)
    logics = p / (jnp.sum(p, axis=-1, keepdims=True) + 1e-13)   # (Bb, E)

    small_ref[:, 0:1, :] = score[:, None, :].astype(small_ref.dtype)
    small_ref[:, 1:2, :] = logics[:, None, :].astype(small_ref.dtype)


def ameli_forward(mention_embed, mention_mask, entity_embeds, entity_mask,
                  entity_mask_tensor, params, *, block_batch=None):
    B, Lm, T = mention_embed.shape
    _, E, Le, _ = entity_embeds.shape
    D = params["wm"].shape[1]

    if block_batch is None:
        # keep the double-buffered entity block comfortably inside the scoped
        # VMEM budget; the entity embedding block is the dominant allocation.
        ent_block_bytes_per_b = E * Le * T * 2          # bf16
        budget = 8 << 20                                # ~8 MiB for this input
        Bb = max(1, min(B, budget // max(1, 2 * ent_block_bytes_per_b), 16))
    else:
        Bb = block_batch
    B_pad = ((B + Bb - 1) // Bb) * Bb
    pad = B_pad - B

    def pad_batch(x):
        if pad == 0:
            return x
        return jnp.pad(x, [(0, pad)] + [(0, 0)] * (x.ndim - 1))

    m_emb = pad_batch(mention_embed)
    e_emb = pad_batch(entity_embeds)
    m_mask = pad_batch(mention_mask.astype(jnp.float32))[..., None]        # (B_pad, Lm, 1)
    e_mask = pad_batch(entity_mask.astype(jnp.float32))[..., None]         # (B_pad, E, Le, 1)
    c_mask = pad_batch(entity_mask_tensor.astype(jnp.float32))[..., None]  # (B_pad, E, 1)

    w2_row = params["w2"].astype(jnp.float32).reshape(1, D)                # (1, D)
    b2_vec = params["b2"].astype(jnp.float32).reshape(1)                   # (1,) -> SMEM

    out_shapes = (
        jax.ShapeDtypeStruct((B_pad, 2, E), jnp.float32),   # [score, logics]
        jax.ShapeDtypeStruct((B_pad, E, D), jnp.float32),   # entity_text_match
    )

    grid_spec = pltpu.PrefetchScalarGridSpec(
        num_scalar_prefetch=0,
        grid=(B_pad // Bb,),
        in_specs=[
            pl.BlockSpec((Bb, Lm, T), lambda b: (b, 0, 0)),
            pl.BlockSpec((Bb, Lm, 1), lambda b: (b, 0, 0)),
            pl.BlockSpec((Bb, E, Le, T), lambda b: (b, 0, 0, 0)),
            pl.BlockSpec((Bb, E, Le, 1), lambda b: (b, 0, 0, 0)),
            pl.BlockSpec((Bb, E, 1), lambda b: (b, 0, 0)),
            pl.BlockSpec((T, D), lambda b: (0, 0)),          # wm (bf16)
            pl.BlockSpec((1, D), lambda b: (0, 0)),          # bm
            pl.BlockSpec((T, D), lambda b: (0, 0)),          # we (bf16)
            pl.BlockSpec((1, D), lambda b: (0, 0)),          # be
            pl.BlockSpec((D, D), lambda b: (0, 0)),          # w1
            pl.BlockSpec((1, D), lambda b: (0, 0)),          # b1
            pl.BlockSpec((1, D), lambda b: (0, 0)),          # w2 row
            pl.BlockSpec(memory_space=pltpu.MemorySpace.SMEM),  # b2 scalar
        ],
        out_specs=[
            pl.BlockSpec((Bb, 2, E), lambda b: (b, 0, 0)),
            pl.BlockSpec((Bb, E, D), lambda b: (b, 0, 0)),
        ],
    )

    small, match = pl.pallas_call(
        _ameli_kernel,
        out_shape=out_shapes,
        grid_spec=grid_spec,
        compiler_params=pltpu.CompilerParams(
            dimension_semantics=("parallel",)),
    )(m_emb, m_mask, e_emb, e_mask, c_mask,
      params["wm"], params["bm"], params["we"], params["be"],
      params["w1"], params["b1"], w2_row, b2_vec)

    score = small[:B, 0, :]     # (B, E)
    logics = small[:B, 1, :]    # (B, E)
    return logics, score, match[:B]


def reference_forward(mention_embed, mention_mask, entity_embeds, entity_mask,
                      entity_mask_tensor, params):
    f32 = jnp.float32
    me = mention_embed.astype(f32)
    ee = entity_embeds.astype(f32)
    wm = params["wm"].astype(f32)
    we = params["we"].astype(f32)

    mm = mention_mask[..., None].astype(f32)                          # (B, Lm, 1)
    proj_m = me @ wm + params["bm"]                                   # (B, Lm, D)
    m_pool = (proj_m * mm).sum(1) / (mm.sum(1) + 1e-9)                # (B, D)

    em = entity_mask[..., None].astype(f32)                           # (B, E, Le, 1)
    proj_e = ee @ we + params["be"]                                   # (B, E, Le, D)
    e_pool = (proj_e * em).sum(2) / (em.sum(2) + 1e-9)                # (B, E, D)

    match = e_pool * m_pool[:, None, :]                               # (B, E, D)
    score = match.sum(-1)                                             # (B, E)
    h = jnp.maximum(match @ params["w1"] + params["b1"], 0.0)
    logits = (h @ params["w2"] + params["b2"])[..., 0]                # (B, E)

    cm = entity_mask_tensor.astype(f32)
    masked = jnp.where(cm > 0, logits, -1e30)
    mx = masked.max(-1, keepdims=True)
    p = jnp.exp(masked - mx) * (cm > 0)
    logics = p / (p.sum(-1, keepdims=True) + 1e-13)
    return logics, score, match


if __name__ == "__main__":
    B, E, Lm, Le, T, D = 2, 8, 8, 16, 128, 128

    key = jax.random.PRNGKey(0)
    ks = jax.random.split(key, 8)

    mention_embed = jax.random.normal(ks[0], (B, Lm, T), jnp.float32).astype(jnp.bfloat16)
    entity_embeds = jax.random.normal(ks[1], (B, E, Le, T), jnp.float32).astype(jnp.bfloat16)

    # token validity masks (variable lengths) and candidate-entity mask
    mention_lens = jnp.array([6, 8])
    mention_mask = (jnp.arange(Lm)[None, :] < mention_lens[:, None]).astype(jnp.float32)
    entity_lens = jax.random.randint(ks[2], (B, E), 4, Le + 1)
    entity_mask = (jnp.arange(Le)[None, None, :] < entity_lens[..., None]).astype(jnp.float32)
    entity_mask_tensor = jnp.ones((B, E), jnp.float32).at[0, E - 2:].set(0.0)

    def init_linear(k, fan_in, fan_out):
        kw, kb = jax.random.split(k)
        bound = 1.0 / (fan_in ** 0.5)
        w = jax.random.uniform(kw, (fan_in, fan_out), jnp.float32, -bound, bound)
        b = jax.random.uniform(kb, (1, fan_out), jnp.float32, -bound, bound)
        return w, b

    wm, bm = init_linear(ks[3], T, D)   # Matcher mention projection
    we, be = init_linear(ks[4], T, D)   # Matcher entity projection
    w1, b1 = init_linear(ks[5], D, D)   # Classifier hidden layer
    w2, b2 = init_linear(ks[6], D, 1)   # Classifier output layer

    params = dict(wm=wm.astype(jnp.bfloat16), bm=bm,
                  we=we.astype(jnp.bfloat16), be=be,
                  w1=w1, b1=b1, w2=w2, b2=b2)

    logics, score, match = ameli_forward(
        mention_embed, mention_mask, entity_embeds, entity_mask,
        entity_mask_tensor, params, block_batch=2)
    jax.block_until_ready((logics, score, match))

    ref_logics, ref_score, ref_match = reference_forward(
        mention_embed, mention_mask, entity_embeds, entity_mask,
        entity_mask_tensor, params)

    assert jnp.allclose(logics, ref_logics, atol=2e-3, rtol=2e-3)
    assert jnp.allclose(score, ref_score, atol=2e-3, rtol=2e-3)
    assert jnp.allclose(match, ref_match, atol=2e-3, rtol=2e-3)

    print("KERNEL_OK")
</pallas_src>

<mosaic_0001>
module attributes {stable_mosaic.version = 11 : i64} {
  func.func @_ameli_kernel(%arg0: i32, %arg1: memref<2x8x128xbf16, #tpu.memory_space<vmem>>, %arg2: memref<2x8x1xf32, #tpu.memory_space<vmem>>, %arg3: memref<2x8x16x128xbf16, #tpu.memory_space<vmem>>, %arg4: memref<2x8x16x1xf32, #tpu.memory_space<vmem>>, %arg5: memref<2x8x1xf32, #tpu.memory_space<vmem>>, %arg6: memref<128x128xbf16, #tpu.memory_space<vmem>>, %arg7: memref<1x128xf32, #tpu.memory_space<vmem>>, %arg8: memref<128x128xbf16, #tpu.memory_space<vmem>>, %arg9: memref<1x128xf32, #tpu.memory_space<vmem>>, %arg10: memref<128x128xf32, #tpu.memory_space<vmem>>, %arg11: memref<1x128xf32, #tpu.memory_space<vmem>>, %arg12: memref<1x128xf32, #tpu.memory_space<vmem>>, %arg13: memref<1xf32, #tpu.memory_space<smem>>, %arg14: memref<2x2x8xf32, #tpu.memory_space<vmem>>, %arg15: memref<2x8x128xf32, #tpu.memory_space<vmem>>) attributes {dimension_semantics = [#tpu.dimension_semantics<parallel>], iteration_bounds = array<i64: 1>, scalar_prefetch = 0 : i64, scratch_operands = 0 : i64, tpu.core_type = #tpu.core_type<tc>, window_params = [{transform_indices = @transform_0, window_bounds = array<i64: 2, 8, 128>}, {transform_indices = @transform_1, window_bounds = array<i64: 2, 8, 1>}, {transform_indices = @transform_2, window_bounds = array<i64: 2, 8, 16, 128>}, {transform_indices = @transform_3, window_bounds = array<i64: 2, 8, 16, 1>}, {transform_indices = @transform_4, window_bounds = array<i64: 2, 8, 1>}, {pipeline_mode = #tpu.pipeline_mode<synchronous>, transform_indices = @transform_5, window_bounds = array<i64: 128, 128>}, {pipeline_mode = #tpu.pipeline_mode<synchronous>, transform_indices = @transform_6, window_bounds = array<i64: 1, 128>}, {pipeline_mode = #tpu.pipeline_mode<synchronous>, transform_indices = @transform_7, window_bounds = array<i64: 128, 128>}, {pipeline_mode = #tpu.pipeline_mode<synchronous>, transform_indices = @transform_8, window_bounds = array<i64: 1, 128>}, {pipeline_mode = #tpu.pipeline_mode<synchronous>, transform_indices = @transform_9, window_bounds = array<i64: 128, 128>}, {pipeline_mode = #tpu.pipeline_mode<synchronous>, transform_indices = @transform_10, window_bounds = array<i64: 1, 128>}, {pipeline_mode = #tpu.pipeline_mode<synchronous>, transform_indices = @transform_11, window_bounds = array<i64: 1, 128>}, {transform_indices = @transform_12, window_bounds = array<i64: 1>}, {transform_indices = @transform_13, window_bounds = array<i64: 2, 2, 8>}, {transform_indices = @transform_14, window_bounds = array<i64: 2, 8, 128>}]} {
    %c0 = arith.constant 0 : index
    %c0_0 = arith.constant 0 : index
    %c0_1 = arith.constant 0 : index
    %0 = vector.load %arg1[%c0, %c0_0, %c0_1] : memref<2x8x128xbf16, #tpu.memory_space<vmem>>, vector<2x8x128xbf16>
    %1 = arith.extf %0 : vector<2x8x128xbf16> to vector<2x8x128xf32>
    %c0_2 = arith.constant 0 : index
    %c0_3 = arith.constant 0 : index
    %c0_4 = arith.constant 0 : index
    %2 = vector.load %arg2[%c0_2, %c0_3, %c0_4] : memref<2x8x1xf32, #tpu.memory_space<vmem>>, vector<2x8x1xf32>
    %3 = vector.broadcast %2 : vector<2x8x1xf32> to vector<2x8x128xf32>
    %4 = arith.mulf %1, %3 : vector<2x8x128xf32>
    %cst = arith.constant dense<0.000000e+00> : vector<2x128xf32>
    %5 = vector.multi_reduction <add>, %4, %cst [1] : vector<2x8x128xf32> to vector<2x128xf32>
    %cst_5 = arith.constant dense<0.000000e+00> : vector<2x1xf32>
    %6 = vector.multi_reduction <add>, %2, %cst_5 [1] : vector<2x8x1xf32> to vector<2x1xf32>
    %c0_6 = arith.constant 0 : index
    %c0_7 = arith.constant 0 : index
    %7 = vector.load %arg6[%c0_6, %c0_7] : memref<128x128xbf16, #tpu.memory_space<vmem>>, vector<128x128xbf16>
    %8 = arith.extf %7 : vector<128x128xbf16> to vector<128x128xf32>
    %cst_8 = arith.constant dense<0.000000e+00> : vector<2x128xf32>
    %9 = tpu.matmul %5, %8, %cst_8 {dimension_numbers = #tpu.dot_dimension_numbers<[1], [0], [0], [1], [0, 0, 1, 1], [], []>} : vector<2x128xf32>, vector<128x128xf32>, vector<2x128xf32> -> vector<2x128xf32>
    %c0_9 = arith.constant 0 : index
    %c0_10 = arith.constant 0 : index
    %10 = vector.load %arg7[%c0_9, %c0_10] : memref<1x128xf32, #tpu.memory_space<vmem>>, vector<1x128xf32>
    %11 = vector.broadcast %6 : vector<2x1xf32> to vector<2x128xf32>
    %12 = vector.broadcast %10 : vector<1x128xf32> to vector<2x128xf32>
    %13 = arith.mulf %11, %12 : vector<2x128xf32>
    %14 = arith.addf %9, %13 : vector<2x128xf32>
    %cst_11 = arith.constant 9.99999971E-10 : f32
    %15 = vector.broadcast %cst_11 : f32 to vector<2x1xf32>
    %16 = arith.addf %6, %15 : vector<2x1xf32>
    %17 = vector.broadcast %16 : vector<2x1xf32> to vector<2x128xf32>
    %18 = arith.divf %14, %17 : vector<2x128xf32>
    %c0_12 = arith.constant 0 : index
    %c0_13 = arith.constant 0 : index
    %c0_14 = arith.constant 0 : index
    %c0_15 = arith.constant 0 : index
    %19 = vector.load %arg3[%c0_12, %c0_13, %c0_14, %c0_15] : memref<2x8x16x128xbf16, #tpu.memory_space<vmem>>, vector<2x8x16x128xbf16>
    %20 = arith.extf %19 : vector<2x8x16x128xbf16> to vector<2x8x16x128xf32>
    %c0_16 = arith.constant 0 : index
    %c0_17 = arith.constant 0 : index
    %c0_18 = arith.constant 0 : index
    %c0_19 = arith.constant 0 : index
    %21 = vector.load %arg4[%c0_16, %c0_17, %c0_18, %c0_19] : memref<2x8x16x1xf32, #tpu.memory_space<vmem>>, vector<2x8x16x1xf32>
    %22 = vector.broadcast %21 : vector<2x8x16x1xf32> to vector<2x8x16x128xf32>
    %23 = arith.mulf %20, %22 : vector<2x8x16x128xf32>
    %cst_20 = arith.constant dense<0.000000e+00> : vector<2x8x128xf32>
    %24 = vector.multi_reduction <add>, %23, %cst_20 [2] : vector<2x8x16x128xf32> to vector<2x8x128xf32>
    %25 = vector.shape_cast %24 : vector<2x8x128xf32> to vector<16x128xf32>
    %cst_21 = arith.constant dense<0.000000e+00> : vector<2x8x1xf32>
    %26 = vector.multi_reduction <add>, %21, %cst_21 [2] : vector<2x8x16x1xf32> to vector<2x8x1xf32>
    %27 = vector.shape_cast %26 : vector<2x8x1xf32> to vector<16x1xf32>
    %c0_22 = arith.constant 0 : index
    %c0_23 = arith.constant 0 : index
    %28 = vector.load %arg8[%c0_22, %c0_23] : memref<128x128xbf16, #tpu.memory_space<vmem>>, vector<128x128xbf16>
    %29 = arith.extf %28 : vector<128x128xbf16> to vector<128x128xf32>
    %cst_24 = arith.constant dense<0.000000e+00> : vector<16x128xf32>
    %30 = tpu.matmul %25, %29, %cst_24 {dimension_numbers = #tpu.dot_dimension_numbers<[1], [0], [0], [1], [0, 0, 1, 1], [], []>} : vector<16x128xf32>, vector<128x128xf32>, vector<16x128xf32> -> vector<16x128xf32>
    %c0_25 = arith.constant 0 : index
    %c0_26 = arith.constant 0 : index
    %31 = vector.load %arg9[%c0_25, %c0_26] : memref<1x128xf32, #tpu.memory_space<vmem>>, vector<1x128xf32>
    %32 = vector.broadcast %27 : vector<16x1xf32> to vector<16x128xf32>
    %33 = vector.broadcast %31 : vector<1x128xf32> to vector<16x128xf32>
    %34 = arith.mulf %32, %33 : vector<16x128xf32>
    %35 = arith.addf %30, %34 : vector<16x128xf32>
    %cst_27 = arith.constant 9.99999971E-10 : f32
    %36 = vector.broadcast %cst_27 : f32 to vector<16x1xf32>
    %37 = arith.addf %27, %36 : vector<16x1xf32>
    %38 = vector.broadcast %37 : vector<16x1xf32> to vector<16x128xf32>
    %39 = arith.divf %35, %38 : vector<16x128xf32>
    %40 = vector.shape_cast %39 : vector<16x128xf32> to vector<2x8x128xf32>
    %41 = vector.shape_cast %18 : vector<2x128xf32> to vector<2x1x128xf32>
    %42 = vector.broadcast %41 : vector<2x1x128xf32> to vector<2x8x128xf32>
    %43 = arith.mulf %40, %42 : vector<2x8x128xf32>
    %c0_28 = arith.constant 0 : index
    %c0_29 = arith.constant 0 : index
    %c0_30 = arith.constant 0 : index
    %44 = vector.load %arg15[%c0_28, %c0_29, %c0_30] : memref<2x8x128xf32, #tpu.memory_space<vmem>>, vector<2x8x128xf32>
    tpu.vector_store %arg15[%c0_28, %c0_29, %c0_30], %43 {strides = array<i32>} : memref<2x8x128xf32, #tpu.memory_space<vmem>>, vector<2x8x128xf32>,
    %cst_31 = arith.constant dense<0.000000e+00> : vector<2x8xf32>
    %45 = vector.multi_reduction <add>, %43, %cst_31 [2] : vector<2x8x128xf32> to vector<2x8xf32>
    %46 = vector.shape_cast %43 : vector<2x8x128xf32> to vector<16x128xf32>
    %c0_32 = arith.constant 0 : index
    %c0_33 = arith.constant 0 : index
    %47 = vector.load %arg10[%c0_32, %c0_33] : memref<128x128xf32, #tpu.memory_space<vmem>>, vector<128x128xf32>
    %cst_34 = arith.constant dense<0.000000e+00> : vector<16x128xf32>
    %48 = tpu.matmul %46, %47, %cst_34 {dimension_numbers = #tpu.dot_dimension_numbers<[1], [0], [0], [1], [0, 0, 1, 1], [], []>} : vector<16x128xf32>, vector<128x128xf32>, vector<16x128xf32> -> vector<16x128xf32>
    %c0_35 = arith.constant 0 : index
    %c0_36 = arith.constant 0 : index
    %49 = vector.load %arg11[%c0_35, %c0_36] : memref<1x128xf32, #tpu.memory_space<vmem>>, vector<1x128xf32>
    %50 = vector.broadcast %49 : vector<1x128xf32> to vector<16x128xf32>
    %51 = arith.addf %48, %50 : vector<16x128xf32>
    %cst_37 = arith.constant 0.000000e+00 : f32
    %52 = vector.broadcast %cst_37 : f32 to vector<16x128xf32>
    %53 = arith.maximumf %51, %52 : vector<16x128xf32>
    %c0_38 = arith.constant 0 : index
    %c0_39 = arith.constant 0 : index
    %54 = vector.load %arg12[%c0_38, %c0_39] : memref<1x128xf32, #tpu.memory_space<vmem>>, vector<1x128xf32>
    %55 = vector.broadcast %54 : vector<1x128xf32> to vector<16x128xf32>
    %56 = arith.mulf %53, %55 : vector<16x128xf32>
    %cst_40 = arith.constant dense<0.000000e+00> : vector<16xf32>
    %57 = vector.multi_reduction <add>, %56, %cst_40 [1] : vector<16x128xf32> to vector<16xf32>
    %58 = vector.shape_cast %57 : vector<16xf32> to vector<16x1xf32>
    %c0_41 = arith.constant 0 : index
    %59 = memref.load %arg13[%c0_41] : memref<1xf32, #tpu.memory_space<smem>>
    %60 = vector.broadcast %59 : f32 to vector<16x1xf32>
    %61 = arith.addf %58, %60 : vector<16x1xf32>
    %62 = vector.shape_cast %61 : vector<16x1xf32> to vector<2x8xf32>
    %c0_42 = arith.constant 0 : index
    %c0_43 = arith.constant 0 : index
    %c0_44 = arith.constant 0 : index
    %63 = vector.load %arg5[%c0_42, %c0_43, %c0_44] : memref<2x8x1xf32, #tpu.memory_space<vmem>>, vector<2x8x1xf32>
    %64 = vector.shape_cast %63 : vector<2x8x1xf32> to vector<2x8xf32>
    %cst_45 = arith.constant 0.000000e+00 : f32
    %65 = vector.broadcast %cst_45 : f32 to vector<2x8xf32>
    %66 = arith.cmpf ogt, %64, %65 : vector<2x8xf32>
    %cst_46 = arith.constant -1.000000e+30 : f32
    %67 = vector.broadcast %cst_46 : f32 to vector<2x8xf32>
    %68 = arith.select %66, %62, %67 : vector<2x8xi1>, vector<2x8xf32>
    %cst_47 = arith.constant dense<0xFF800000> : vector<2xf32>
    %69 = vector.multi_reduction <maximumf>, %68, %cst_47 [1] : vector<2x8xf32> to vector<2xf32>
    %70 = vector.shape_cast %69 : vector<2xf32> to vector<2x1xf32>
    %71 = vector.broadcast %70 : vector<2x1xf32> to vector<2x8xf32>
    %72 = arith.subf %68, %71 : vector<2x8xf32>
    %73 = math.exp %72 : vector<2x8xf32>
    %74 = arith.extui %66 : vector<2x8xi1> to vector<2x8xi32>
    %75 = arith.sitofp %74 : vector<2x8xi32> to vector<2x8xf32>
    %76 = arith.mulf %73, %75 : vector<2x8xf32>
    %cst_48 = arith.constant dense<0.000000e+00> : vector<2xf32>
    %77 = vector.multi_reduction <add>, %76, %cst_48 [1] : vector<2x8xf32> to vector<2xf32>
    %78 = vector.shape_cast %77 : vector<2xf32> to vector<2x1xf32>
    %cst_49 = arith.constant 9.99999982E-14 : f32
    %79 = vector.broadcast %cst_49 : f32 to vector<2x1xf32>
    %80 = arith.addf %78, %79 : vector<2x1xf32>
    %81 = vector.broadcast %80 : vector<2x1xf32> to vector<2x8xf32>
    %82 = arith.divf %76, %81 : vector<2x8xf32>
    %83 = vector.shape_cast %45 : vector<2x8xf32> to vector<2x1x8xf32>
    %c0_50 = arith.constant 0 : index
    %c0_51 = arith.constant 0 : index
    %c0_52 = arith.constant 0 : index
    %84 = vector.load %arg14[%c0_50, %c0_51, %c0_52] : memref<2x2x8xf32, #tpu.memory_space<vmem>>, vector<2x1x8xf32>
    tpu.vector_store %arg14[%c0_50, %c0_51, %c0_52], %83 {strides = array<i32>} : memref<2x2x8xf32, #tpu.memory_space<vmem>>, vector<2x1x8xf32>,
    %85 = vector.shape_cast %82 : vector<2x8xf32> to vector<2x1x8xf32>
    %c0_53 = arith.constant 0 : index
    %c1 = arith.constant 1 : index
    %c0_54 = arith.constant 0 : index
    %86 = vector.load %arg14[%c0_53, %c1, %c0_54] : memref<2x2x8xf32, #tpu.memory_space<vmem>>, vector<2x1x8xf32>
    tpu.vector_store %arg14[%c0_53, %c1, %c0_54], %85 {strides = array<i32>} : memref<2x2x8xf32, #tpu.memory_space<vmem>>, vector<2x1x8xf32>,
    return
  }
  func.func @transform_0(%arg0: i32) -> (i32, i32, i32) {
    %c0_i32 = arith.constant 0 : i32
    %c0_i32_0 = arith.constant 0 : i32
    %c0_i32_1 = arith.constant 0 : i32
    return %arg0, %c0_i32, %c0_i32_0 : i32, i32, i32
  }
  func.func @transform_1(%arg0: i32) -> (i32, i32, i32) {
    %c0_i32 = arith.constant 0 : i32
    %c0_i32_0 = arith.constant 0 : i32
    %c0_i32_1 = arith.constant 0 : i32
    return %arg0, %c0_i32, %c0_i32_0 : i32, i32, i32
  }
  func.func @transform_2(%arg0: i32) -> (i32, i32, i32, i32) {
    %c0_i32 = arith.constant 0 : i32
    %c0_i32_0 = arith.constant 0 : i32
    %c0_i32_1 = arith.constant 0 : i32
    %c0_i32_2 = arith.constant 0 : i32
    return %arg0, %c0_i32, %c0_i32_0, %c0_i32_1 : i32, i32, i32, i32
  }
  func.func @transform_3(%arg0: i32) -> (i32, i32, i32, i32) {
    %c0_i32 = arith.constant 0 : i32
    %c0_i32_0 = arith.constant 0 : i32
    %c0_i32_1 = arith.constant 0 : i32
    %c0_i32_2 = arith.constant 0 : i32
    return %arg0, %c0_i32, %c0_i32_0, %c0_i32_1 : i32, i32, i32, i32
  }
  func.func @transform_4(%arg0: i32) -> (i32, i32, i32) {
    %c0_i32 = arith.constant 0 : i32
    %c0_i32_0 = arith.constant 0 : i32
    %c0_i32_1 = arith.constant 0 : i32
    return %arg0, %c0_i32, %c0_i32_0 : i32, i32, i32
  }
  func.func @transform_5(%arg0: i32) -> (i32, i32) {
    %c0_i32 = arith.constant 0 : i32
    %c0_i32_0 = arith.constant 0 : i32
    %c0_i32_1 = arith.constant 0 : i32
    return %c0_i32, %c0_i32_0 : i32, i32
  }
  func.func @transform_6(%arg0: i32) -> (i32, i32) {
    %c0_i32 = arith.constant 0 : i32
    %c0_i32_0 = arith.constant 0 : i32
    %c0_i32_1 = arith.constant 0 : i32
    return %c0_i32, %c0_i32_0 : i32, i32
  }
  func.func @transform_7(%arg0: i32) -> (i32, i32) {
    %c0_i32 = arith.constant 0 : i32
    %c0_i32_0 = arith.constant 0 : i32
    %c0_i32_1 = arith.constant 0 : i32
    return %c0_i32, %c0_i32_0 : i32, i32
  }
  func.func @transform_8(%arg0: i32) -> (i32, i32) {
    %c0_i32 = arith.constant 0 : i32
    %c0_i32_0 = arith.constant 0 : i32
    %c0_i32_1 = arith.constant 0 : i32
    return %c0_i32, %c0_i32_0 : i32, i32
  }
  func.func @transform_9(%arg0: i32) -> (i32, i32) {
    %c0_i32 = arith.constant 0 : i32
    %c0_i32_0 = arith.constant 0 : i32
    %c0_i32_1 = arith.constant 0 : i32
    return %c0_i32, %c0_i32_0 : i32, i32
  }
  func.func @transform_10(%arg0: i32) -> (i32, i32) {
    %c0_i32 = arith.constant 0 : i32
    %c0_i32_0 = arith.constant 0 : i32
    %c0_i32_1 = arith.constant 0 : i32
    return %c0_i32, %c0_i32_0 : i32, i32
  }
  func.func @transform_11(%arg0: i32) -> (i32, i32) {
    %c0_i32 = arith.constant 0 : i32
    %c0_i32_0 = arith.constant 0 : i32
    %c0_i32_1 = arith.constant 0 : i32
    return %c0_i32, %c0_i32_0 : i32, i32
  }
  func.func @transform_12(%arg0: i32) -> i32 {
    %c0_i32 = arith.constant 0 : i32
    %c0_i32_0 = arith.constant 0 : i32
    return %c0_i32 : i32
  }
  func.func @transform_13(%arg0: i32) -> (i32, i32, i32) {
    %c0_i32 = arith.constant 0 : i32
    %c0_i32_0 = arith.constant 0 : i32
    %c0_i32_1 = arith.constant 0 : i32
    return %arg0, %c0_i32, %c0_i32_0 : i32, i32, i32
  }
  func.func @transform_14(%arg0: i32) -> (i32, i32, i32) {
    %c0_i32 = arith.constant 0 : i32
    %c0_i32_0 = arith.constant 0 : i32
    %c0_i32_1 = arith.constant 0 : i32
    return %arg0, %c0_i32, %c0_i32_0 : i32, i32, i32
  }
}

</mosaic_0001>

<bundles_post_ra>
// kernel: tpu_custom_call.1
= control target key start
LH: loop header
LB: loop body
LE: loop exit
PB: predicated region body
PF: predicated region fallthrough
CT: control target
= control target key end

     0   :  { %21 = vsyncpa [#allocation4], 0  ;;  %s2435_s0 = inlined_call_operand.vmem [shape: bf16[2,8,128], index: 0, kind: input, shape index: {}]   ;;  %s2436_s1 = inlined_call_operand.vmem [shape: f32[2,8,1], index: 1, kind: input, shape index: {}]   ;;  %s2437_s2 = inlined_call_operand.vmem [shape: bf16[2,8,16,128], index: 2, kind: input, shape index: {}]   ;;  %s2438_s3 = inlined_call_operand.vmem [shape: f32[2,8,16,1], index: 3, kind: input, shape index: {}]   ;;  %s2439_s4 = inlined_call_operand.vmem [shape: f32[2,8,1], index: 4, kind: input, shape index: {}]   ;;  %s2440_s5 = inlined_call_operand.hbm [shape: bf16[128,128], index: 5, kind: input, shape index: {}]   ;;  %s2441_s6 = inlined_call_operand.vmem [shape: f32[1,128], index: 6, kind: input, shape index: {}]   ;;  %s2442_s7 = inlined_call_operand.hbm [shape: bf16[128,128], index: 7, kind: input, shape index: {}]   ;;  %s2443_s8 = inlined_call_operand.vmem [shape: f32[1,128], index: 8, kind: input, shape index: {}]   ;;  %s2444_s9 = inlined_call_operand.vmem [shape: f32[128,128], index: 9, kind: input, shape index: {}]   ;;  %s2445_s10 = inlined_call_operand.vmem [shape: f32[1,128], index: 10, kind: input, shape index: {}]   ;;  %s2446_s11 = inlined_call_operand.vmem [shape: f32[1,128], index: 11, kind: input, shape index: {}]   ;;  %s2447_s12 = inlined_call_operand.<no memory space> [shape: f32[1], index: 12, kind: input, shape index: {}]   ;;  %s2448_s13 = inlined_call_operand.hbm [shape: f32[2,2,8], index: 13, kind: output, shape index: {0}]   ;;  %s2449_s14 = inlined_call_operand.hbm [shape: f32[2,8,128], index: 14, kind: output, shape index: {1}]  }
   0x1   :  { %22 = vsyncpa [#allocation7], 0 }
   0x2   :  { %23 = vsyncpa [#allocation5], 0 }
   0x3   :  { %24 = vsyncpa [#allocation10], 0  ;;  %s39_s15 = sshll.u32 %s2440_s5, 4  ;;  %s1682_s16 = smov [#allocation3]   ;;  %s40_s15 = int_to_ptr.hbm [resolvable:$true] %s39_s15 }
   0x4   :  { %s41_s17 = sshll.u32 %s1682_s16, 4  ;;  %s54_s20 = sshll.u32 %s2442_s7, 4  ;;  %s42_s17 = int_to_ptr.vmem [resolvable:$true] %s41_s17  ;;  %s55_s20 = int_to_ptr.hbm [resolvable:$true] %s54_s20 }
   0x5   :  { %s1683_s21 = smov 64   ;;  %s1684_s22 = smov 4  }
   0x6   :  { %47 = dma.hbm_to_vmem [thread:$0]  %s40_s15, 1024, %s42_s17, [#allocation4], %s1683_s21, %s1683_s21, %s1684_s22  }
   0x7   :  { %s1685_s23 = smov [#allocation6]  }
   0x8   :  { %s56_s24 = sshll.u32 %s1685_s23, 4  ;;  %s57_s24 = int_to_ptr.vmem [resolvable:$true] %s56_s24 }
   0x9   :  { %62 = dma.hbm_to_vmem [thread:$0]  %s55_s20, 1024, %s57_s24, [#allocation7], %s1683_s21, %s1683_s21, %s1684_s22  }
   0xa   :  { %1674 = dma.done.wait [#allocation4], 1024  }
   0xb   :  { %1675 = vsyncadd [#allocation4], 4294966272 }
   0xc   :  { %1676 = dma.done.wait [#allocation7], 1024  }
   0xd   :  { %1677 = vsyncadd [#allocation7], 4294966272  ;;  %v1686_v0 = vmov 0   ;;  %vm111_vm0 = vcmask 7168   ;;  %v299_v1 = vld [vmem:[%s2438_s3 + $0x20] sm:$0xff]  ;;  %v297_v2 = vld [vmem:[%s2438_s3 + $0x10] sm:$0xff] }
   0xe   :  { %1559 = vset.pattern.permute.xlu2 %v1686_v0  ;;  %1558 = vset.pattern.permute.xlu1 %v1686_v0  ;;  %v295_v3 = vld [vmem:[%s2438_s3] sm:$0xff]  ;;  %v649_v4 = vsel %vm111_vm0, %v299_v1, 0.0  ;;  %v300_v5 = vld [vmem:[%s2438_s3 + $0x28] sm:$0xff]  ;;  %v314_v8 = vld [vmem:[%s2438_s3 + $0x98] sm:$0xff]  ;;  %v640_v31 = vsel %vm111_vm0, %v297_v2, 0.0  ;;  %vm176_vm1 = vcmask 1041409  }
   0xf   :  { %1557 = vset.pattern.permute.xlu0 %v1686_v0  ;;  %349 = vperm.xlu2 %1559, %v299_v1   ;;  %v650_v6 = vsel %vm111_vm0, %v300_v5, 0.0  ;;  %v313_v9 = vld [vmem:[%s2438_s3 + $0x90] sm:$0xff]  ;;  %v311_v10 = vld [vmem:[%s2438_s3 + $0x80] sm:$0xff]  ;;  %v713_v11 = vsel %vm111_vm0, %v314_v8, 0.0  ;;  %v312_v14 = vld [vmem:[%s2438_s3 + $0x88] sm:$0xff]  ;;  %v631_v32 = vsel %vm111_vm0, %v295_v3, 0.0 }
  0x10   :  { %339 = vperm.xlu1 %1558, %v297_v2   ;;  %329 = vperm.xlu0 %1557, %v295_v3   ;;  %v1789_v7 = vadd.f32 %v650_v6, %v649_v4  ;;  %v712_v12 = vsel %vm111_vm0, %v313_v9, 0.0  ;;  %v703_v13 = vsel %vm111_vm0, %v311_v10, 0.0  ;;  %v298_v15 = vld [vmem:[%s2438_s3 + $0x18] sm:$0xff]  ;;  %v704_v17 = vsel %vm111_vm0, %v312_v14, 0.0  ;;  %v296_v18 = vld [vmem:[%s2438_s3 + $0x8] sm:$0xff]  ;;  %v301_v21 = vld [vmem:[%s2438_s3 + $0x30] sm:$0xff] }
  0x11   :  { %v1809_v16 = vadd.f32 %v713_v11, %v712_v12  ;;  %v1815_v19 = vadd.f32 %v704_v17, %v703_v13  ;;  %v302_v20 = vld [vmem:[%s2438_s3 + $0x38] sm:$0xff]  ;;  %v1826_v22 = vld [vmem:[%s2438_s3 + $0xa0] sm:$0xff]  ;;  %v304_v23 = vld [vmem:[%s2438_s3 + $0x48] sm:$0xff]  ;;  %v641_v33 = vsel %vm111_vm0, %v298_v15, 0.0  ;;  %v632_v34 = vsel %vm111_vm0, %v296_v18, 0.0  ;;  %s1347_s28 = sshll.u32 %s2449_s14, 4  ;;  %s1348_s28 = int_to_ptr.hbm [resolvable:$true] %s1347_s28 }
  0x12   :  { %v303_v24 = vld [vmem:[%s2438_s3 + $0x40] sm:$0xff]  ;;  %v306_v25 = vld [vmem:[%s2438_s3 + $0x58] sm:$0xff]  ;;  %v305_v26 = vld [vmem:[%s2438_s3 + $0x50] sm:$0xff]  ;;  %v642_v38 = vadd.f32 %v641_v33, %v640_v31  ;;  %v633_v39 = vadd.f32 %v632_v34, %v631_v32  ;;  %v659_v40 = vsel %vm111_vm0, %v302_v20, 0.0  ;;  %v658_v41 = vsel %vm111_vm0, %v301_v21, 0.0  ;;  %s1690_s29 = smov 8  }
  0x13   :  { %v1844_v27 = vld [vmem:[%s2438_s3 + $0xa8] sm:$0xff]  ;;  %v1850_v28 = vld [vmem:[%s2438_s3 + $0x60] sm:$0xff]  ;;  %v1855_v29 = vld [vmem:[%s2438_s3 + $0xb8] sm:$0xff]  ;;  %v668_v44 = vsel %vm111_vm0, %v304_v23, 0.0  ;;  %v667_v45 = vsel %vm111_vm0, %v303_v24, 0.0  ;;  %v660_v49 = vadd.f32 %v659_v40, %v658_v41  ;;  %v677_v55 = vsel %vm111_vm0, %v306_v25, 0.0 }
  0x14   :  { %v1860_v30 = vld [vmem:[%s2438_s3 + $0xb0] sm:$0xff]  ;;  %v1872_v35 = vld [vmem:[%s2438_s3 + $0xc8] sm:$0xff]  ;;  %v1877_v36 = vld [vmem:[%s2438_s3 + $0xc0] sm:$0xff]  ;;  %v643_v42 = vrot.slane %v642_v38, 4  ;;  %v634_v43 = vrot.slane %v633_v39, 4  ;;  %v669_v50 = vadd.f32 %v668_v44, %v667_v45  ;;  %v676_v56 = vsel %vm111_vm0, %v305_v26, 0.0 }
  0x15   :  { %v308_v37 = vld [vmem:[%s2438_s3 + $0x68] sm:$0xff]  ;;  %v309_v46 = vld [vmem:[%s2438_s3 + $0x70] sm:$0xff]  ;;  %v85_v48 = vld [vmem:[%s2436_s1] sm:$0xff]  ;;  %v661_v53 = vrot.slane %v660_v49, 4  ;;  %v652_v59 = vrot.slane %v1789_v7, 4  ;;  %v678_v62 = vadd.f32 %v677_v55, %v676_v56  ;;  %v706_v40 = vrot.slane %v1815_v19, 4 }
  0x16   :  { %v86_v47 = vld [vmem:[%s2436_s1 + $0x8] sm:$0xff]  ;;  %v644_v51 = vadd.f32 %v643_v42, %v642_v38  ;;  %v635_v52 = vadd.f32 %v634_v43, %v633_v39  ;;  %v670_v54 = vrot.slane %v669_v50, 4  ;;  %v1903_v60 = vld [vmem:[%s2438_s3 + $0xd8] sm:$0xff]  ;;  %v1908_v61 = vld [vmem:[%s2438_s3 + $0xd0] sm:$0xff]  ;;  %v694_v12 = vsel %vm111_vm0, %v309_v46, 0.0  ;;  %s1691_s30 = smov [#allocation8]  }
  0x17   :  { %354 = vperm.xlu2 %1559, %v300_v5   ;;  %v310_v63 = vld [vmem:[%s2438_s3 + $0x78] sm:$0xff]  ;;  %v662_v0 = vadd.f32 %v661_v53, %v660_v49  ;;  %v119_v4 = vsel %vm111_vm0, %v86_v47, 0.0  ;;  %v653_v5 = vadd.f32 %v652_v59, %v1789_v7  ;;  %v679_v6 = vrot.slane %v678_v62, 4  ;;  %v1928_v7 = vld [vmem:[%s2438_s3 + $0xe8] sm:$0xff]  ;;  %s1332_s15 = sshll.u32 %s1691_s30, 4  ;;  %s1334_s14 = sshll.u32 %s2448_s13, 4  ;;  %s1333_s15 = int_to_ptr.vmem [resolvable:$true] %s1332_s15  ;;  %s1335_s14 = int_to_ptr.hbm [resolvable:$true] %s1334_s14 }
  0x18   :  { %344 = vperm.xlu1 %1558, %v298_v15   ;;  %334 = vperm.xlu0 %1557, %v296_v18   ;;  %v645_v57 = vrot.slane %v644_v51, 2  ;;  %v636_v58 = vrot.slane %v635_v52, 2  ;;  %v671_v1 = vadd.f32 %v670_v54, %v669_v50  ;;  %v120_v11 = vrot.slane %v119_v4, 4  ;;  %s1692_s18 = smov 32   ;;  %s1693_s19 = smov 2  }
  0x19   :  { %v695_v13 = vsel %vm111_vm0, %v310_v63, 0.0  ;;  %v654_v17 = vrot.slane %v653_v5, 2  ;;  %v721_v41 = vsel %vm111_vm0, %v1826_v22, 0.0  ;;  %v722_v43 = vsel %vm111_vm0, %v1844_v27, 0.0 }
  0x1a   :  { %v646_v2 = vadd.f32 %v645_v57, %v644_v51  ;;  %v637_v3 = vadd.f32 %v636_v58, %v635_v52  ;;  %v121_v31 = vadd.f32 %v120_v11, %v119_v4  ;;  %v696_v32 = vadd.f32 %v695_v13, %v694_v12 }
  0x1b   :  { %v731_v44 = vsel %vm111_vm0, %v1855_v29, 0.0  ;;  %v730_v45 = vsel %vm111_vm0, %v1860_v30, 0.0  ;;  %v707_v54 = vadd.f32 %v706_v40, %v1815_v19  ;;  %v739_v4 = vsel %vm111_vm0, %v1877_v36, 0.0 }
  0x1c   :  { %v638_v15 = vrot.slane %v637_v3, 1  ;;  %v732_v55 = vadd.f32 %v731_v44, %v730_v45  ;;  %v715_v11 = vrot.slane %v1809_v16, 4  ;;  %vm924_vm2 = vcmask 1042434  }
  0x1d   :  { %vm926_vm3 = vcmask 1043459   ;;  %vm928_vm4 = vcmask 1044484   ;;  %vm930_vm5 = vcmask 1045509   ;;  %vm932_vm6 = vcmask 1046534  }
  0x1e   :  { %v1942_v38 = vadd.f32 %v638_v15, %v637_v3  ;;  %v740_v3 = vsel %vm111_vm0, %v1872_v35, 0.0  ;;  %vm934_vm7 = vcmask 1047559  }
  0x1f   :  { %409 = vperm.xlu2 %1559, %v311_v10   ;;  %v672_v10 = vrot.slane %v671_v1, 2 }
  0x20   :  { %364 = vperm.xlu1 %1558, %v302_v20   ;;  %359 = vperm.xlu0 %1557, %v301_v21   ;;  %v1923_v20 = vld [vmem:[%s2438_s3 + $0xf0] sm:$0xff]  ;;  %v680_v21 = vadd.f32 %v679_v6, %v678_v62  ;;  %v1014_v49 = vadd.f32 1e-09, %v1942_v38 }
  0x21   :  { %v673_v33 = vadd.f32 %v672_v10, %v671_v1 }
  0x22   :  { %v681_v42 = vrot.slane %v680_v21, 2 }
  0x23   :  { %v674_v50 = vrot.slane %v673_v33, 1 }
  0x25   :  { %v1962_v58 = vadd.f32 %v674_v50, %v673_v33 }
  0x27   :  { %424 = vperm.xlu2 %1559, %v314_v8   ;;  %v112_v8 = vsel %vm111_vm0, %v85_v48, 0.0 }
  0x28   :  { %419 = vperm.xlu1 %1558, %v313_v9   ;;  %414 = vperm.xlu0 %1557, %v312_v14   ;;  %v663_v9 = vrot.slane %v662_v0, 2  ;;  %v647_v14 = vrot.slane %v646_v2, 1  ;;  %v113_v18 = vrot.slane %v112_v8, 4 }
  0x2a   :  { %v1940_v34 = vadd.f32 %v647_v14, %v646_v2  ;;  %v733_v2 = vrot.slane %v732_v55, 4 }
  0x2f   :  { %429 = vperm.xlu2 %1559, %v1826_v22  }
  0x30   :  { %374 = vperm.xlu1 %1558, %v304_v23   ;;  %369 = vperm.xlu0 %1557, %v303_v24   ;;  %v685_v23 = vsel %vm111_vm0, %v1850_v28, 0.0  ;;  %v686_v24 = vsel %vm111_vm0, %v308_v37, 0.0 }
  0x31   :  { %v687_v39 = vadd.f32 %v686_v24, %v685_v23 }
  0x33   :  { %v688_v52 = vrot.slane %v687_v39, 4 }
  0x35   :  { %v689_v62 = vadd.f32 %v688_v52, %v687_v39 }
  0x37   :  { %384 = vperm.xlu2 %1559, %v306_v25   ;;  %v1936_v25 = vld [vmem:[%s2438_s3 + $0xe0] sm:$0xff]  ;;  %v690_v12 = vrot.slane %v689_v62, 2 }
  0x38   :  { %379 = vperm.xlu1 %1558, %v305_v26   ;;  %434 = vperm.xlu0 %1557, %v1844_v27   ;;  %v664_v26 = vadd.f32 %v663_v9, %v662_v0  ;;  %v723_v27 = vadd.f32 %v722_v43, %v721_v41  ;;  %v708_v0 = vrot.slane %v707_v54, 2 }
  0x3a   :  { %v665_v51 = vrot.slane %v664_v26, 1  ;;  %v724_v1 = vrot.slane %v723_v27, 4  ;;  %v709_v15 = vadd.f32 %v708_v0, %v707_v54 }
  0x3c   :  { %v1964_v59 = vadd.f32 %v665_v51, %v664_v26  ;;  %v716_v26 = vadd.f32 %v715_v11, %v1809_v16  ;;  %v710_v41 = vrot.slane %v709_v15, 1  ;;  %v749_v16 = vsel %vm111_vm0, %v1903_v60, 0.0 }
  0x3e   :  { %v1017_v9 = vadd.f32 1e-09, %v1964_v59  ;;  %v717_v43 = vrot.slane %v716_v26, 2  ;;  %v1993_v50 = vadd.f32 %v710_v41, %v709_v15 }
  0x3f   :  { %389 = vperm.xlu2 %1559, %v1850_v28   ;;  %v655_v28 = vadd.f32 %v654_v17, %v653_v5  ;;  %v725_v17 = vadd.f32 %v724_v1, %v723_v27  ;;  %v758_v1 = vsel %vm111_vm0, %v1928_v7, 0.0 }
  0x40   :  { %444 = vperm.xlu1 %1558, %v1855_v29   ;;  %439 = vperm.xlu0 %1557, %v1860_v30   ;;  %v1960_v29 = vld [vmem:[%s2438_s3 + $0xf8] sm:$0xff]  ;;  %v682_v30 = vadd.f32 %v681_v42, %v680_v21  ;;  %v718_v52 = vadd.f32 %v717_v43, %v716_v26  ;;  %v1022_v27 = vadd.f32 1e-09, %v1993_v50 }
  0x41   :  { %v656_v53 = vrot.slane %v655_v28, 1  ;;  %v726_v33 = vrot.slane %v725_v17, 2 }
  0x42   :  { %v683_v10 = vrot.slane %v682_v30, 1  ;;  %v719_v0 = vrot.slane %v718_v52, 1 }
  0x43   :  { %v1967_v19 = vadd.f32 %v656_v53, %v655_v28 }
  0x44   :  { %v1979_v23 = vadd.f32 %v683_v10, %v682_v30 }
  0x45   :  { %v1016_v14 = vadd.f32 1e-09, %v1967_v19 }
  0x47   :  { %454 = vperm.xlu2 %1559, %v1872_v35   ;;  %v741_v35 = vadd.f32 %v740_v3, %v739_v4 }
  0x48   :  { %449 = vperm.xlu1 %1558, %v1877_v36   ;;  %394 = vperm.xlu0 %1557, %v308_v37   ;;  %v114_v37 = vadd.f32 %v113_v18, %v112_v8  ;;  %v1018_v8 = vadd.f32 1e-09, %v1962_v58  ;;  %v734_v18 = vadd.f32 %v733_v2, %v732_v55  ;;  %v757_v2 = vsel %vm111_vm0, %v1936_v25, 0.0 }
  0x49   :  { %v742_v39 = vrot.slane %v741_v35, 4 }
  0x4a   :  { %v115_v22 = vrot.slane %v114_v37, 2  ;;  %v735_v28 = vrot.slane %v734_v18, 2 }
  0x4f   :  { %399 = vperm.xlu2 %1559, %v309_v46   ;;  %v122_v46 = vrot.slane %v121_v31, 2 }
  0x50   :  { %94 = vperm.xlu1 %1558, %v86_v47   ;;  %89 = vperm.xlu0 %1557, %v85_v48   ;;  %v697_v47 = vrot.slane %v696_v32, 4  ;;  %v1015_v48 = vadd.f32 1e-09, %v1940_v34 }
  0x51   :  { %v123_v56 = vadd.f32 %v122_v46, %v121_v31  ;;  %v691_v31 = vadd.f32 %v690_v12, %v689_v62  ;;  %v748_v46 = vsel %vm111_vm0, %v1908_v61, 0.0  ;;  %v767_v62 = vsel %vm111_vm0, %v1960_v29, 0.0 }
  0x52   :  { %v698_v57 = vadd.f32 %v697_v47, %v696_v32  ;;  %v727_v47 = vadd.f32 %v726_v33, %v725_v17 }
  0x53   :  { %v124_v5 = vrot.slane %v123_v56, 1  ;;  %v692_v45 = vrot.slane %v691_v31, 1 }
  0x54   :  { %v699_v6 = vrot.slane %v698_v57, 2 }
  0x55   :  { %v1981_v24 = vadd.f32 %v124_v5, %v123_v56  ;;  %v1999_v54 = vadd.f32 %v692_v45, %v691_v31  ;;  %v728_v56 = vrot.slane %v727_v47, 1 }
  0x56   :  { %v700_v36 = vadd.f32 %v699_v6, %v698_v57 }
  0x57   :  { %464 = vperm.xlu2 %1559, %v1903_v60   ;;  %v205_v40 = vadd.f32 1e-09, %v1981_v24  ;;  %v2014_v5 = vadd.f32 %v728_v56, %v727_v47 }
  0x58   :  { %459 = vperm.xlu1 %1558, %v1908_v61   ;;  %404 = vperm.xlu0 %1557, %v310_v63   ;;  %v116_v63 = vadd.f32 %v115_v22, %v114_v37  ;;  %v1019_v37 = vadd.f32 1e-09, %v1979_v23  ;;  %v701_v42 = vrot.slane %v700_v36, 1  ;;  %v750_v22 = vadd.f32 %v749_v16, %v748_v46 }
  0x59   :  { %v766_v61 = vsel %vm111_vm0, %v1923_v20, 0.0 }
  0x5a   :  { %v117_v13 = vrot.slane %v116_v63, 1  ;;  %v1995_v51 = vadd.f32 %v701_v42, %v700_v36  ;;  %v751_v57 = vrot.slane %v750_v22, 4  ;;  %v768_v3 = vadd.f32 %v767_v62, %v766_v61  ;;  %v1506_v62 = vld [vmem:[#allocation3 + $0x38] sm:$0xff]  }
  0x5c   :  { %v1984_v32 = vadd.f32 %v117_v13, %v116_v63  ;;  %v1021_v30 = vadd.f32 1e-09, %v1995_v51  ;;  %v1020_v63 = vadd.f32 1e-09, %v1999_v54  ;;  %v752_v6 = vadd.f32 %v751_v57, %v750_v22 }
  0x5d   :  { %v769_v11 = vrot.slane %v768_v3, 4  ;;  %v1024_v13 = vadd.f32 1e-09, %v2014_v5 }
  0x5e   :  { %v204_v44 = vadd.f32 1e-09, %v1984_v32  ;;  %v753_v15 = vrot.slane %v752_v6, 2 }
  0x5f   :  { %479 = vperm.xlu2 %1559, %v1923_v20   ;;  %v770_v31 = vadd.f32 %v769_v11, %v768_v3 }
  0x60   :  { %474 = vperm.xlu1 %1558, %v1928_v7   ;;  %469 = vperm.xlu0 %1557, %v1936_v25   ;;  %v1507_v7 = vld [vmem:[%s2437_s2 + $0x8] sm:$0xff]  }
  0x61   :  { %v1411_v26 = vunpack.c.h.bf16 %v1507_v7  ;;  %v771_v45 = vrot.slane %v770_v31, 2 }
  0x67   :  { %1036 = vperm.xlu2 %1559, %v1015_v48   ;;  %v743_v48 = vadd.f32 %v742_v39, %v741_v35  ;;  %v1405_v35 = vld [vmem:[%s2437_s2] sm:$0xff]  }
  0x68   :  { %1032 = vperm.xlu1 %1558, %v1014_v49   ;;  %484 = vperm.xlu0 %1557, %v1960_v29   ;;  %v736_v49 = vadd.f32 %v735_v28, %v734_v18  ;;  %v2016_v29 = vadd.f32 %v719_v0, %v718_v52  ;;  %v1410_v18 = vunpack.c.l.bf16 %v1507_v7  ;;  %v1406_v33 = vunpack.c.l.bf16 %v1405_v35 }
  0x69   :  { %v1977_v21 = vpop.permute.xlu2 %349  ;;  %v744_v60 = vrot.slane %v743_v48, 2  ;;  %v1407_v28 = vunpack.c.h.bf16 %v1405_v35 }
  0x6a   :  { %v737_v55 = vrot.slane %v736_v49, 1  ;;  %v1023_v36 = vadd.f32 1e-09, %v2016_v29 }
  0x6b   :  { %v745_v20 = vadd.f32 %v744_v60, %v743_v48 }
  0x6c   :  { %v2012_v4 = vadd.f32 %v737_v55, %v736_v49 }
  0x6e   :  { %v1025_v12 = vadd.f32 1e-09, %v2012_v4 }
  0x6f   :  { %1048 = vperm.xlu2 %1559, %v1018_v8   ;;  %v759_v8 = vadd.f32 %v758_v1, %v757_v2 }
  0x70   :  { %1044 = vperm.xlu1 %1558, %v1017_v9   ;;  %1040 = vperm.xlu0 %1557, %v1016_v14   ;;  %v746_v14 = vrot.slane %v745_v20, 1 }
  0x71   :  { %v1997_v53 = vpop.permute.xlu2 %354  ;;  %v760_v17 = vrot.slane %v759_v8, 4 }
  0x72   :  { %v2029_v39 = vadd.f32 %v746_v14, %v745_v20  ;;  %v1403_v20 = vunpack.c.h.bf16 %v1506_v62 }
  0x74   :  { %v1026_v47 = vadd.f32 1e-09, %v2029_v39  ;;  %184 = vmatpush.msra.mxu0 %v1403_v20 }
  0x77   :  { %1052 = vperm.xlu2 %1559, %v1019_v37   ;;  %v754_v37 = vadd.f32 %v753_v15, %v752_v6 }
  0x78   :  { %212 = vperm.xlu1 %1558, %v205_v40   ;;  %208 = vperm.xlu0 %1557, %v204_v44   ;;  %v761_v40 = vadd.f32 %v760_v17, %v759_v8  ;;  %v1402_v8 = vunpack.c.l.bf16 %v1506_v62 }
  0x79   :  { %v2021_v10 = vpop.permute.xlu2 %409  ;;  %v755_v22 = vrot.slane %v754_v37, 1 }
  0x7a   :  { %v762_v48 = vrot.slane %v761_v40, 2  ;;  %185 = vmatpush.msra.mxu0 %v1402_v8  ;;  %v1509_v8 = vld [vmem:[%s2437_s2 + $0x18] sm:$0xff]  }
  0x7b   :  { %v2036_v57 = vadd.f32 %v755_v22, %v754_v37 }
  0x7c   :  { %v763_v55 = vadd.f32 %v762_v48, %v761_v40 }
  0x7e   :  { %v764_v7 = vrot.slane %v763_v55, 1 }
  0x7f   :  { %1064 = vperm.xlu2 %1559, %v1022_v27   ;;  %v772_v27 = vadd.f32 %v771_v45, %v770_v31 }
  0x80   :  { %1060 = vperm.xlu1 %1558, %v1021_v30   ;;  %1056 = vperm.xlu0 %1557, %v1020_v63   ;;  %v2049_v35 = vadd.f32 %v764_v7, %v763_v55 }
  0x81   :  { %v2032_v49 = vpop.permute.xlu2 %424  ;;  %v773_v6 = vrot.slane %v772_v27, 1 }
  0x82   :  { %v340_v9 = vpop.permute.xlu1 %339  ;;  %v330_v25 = vpop.permute.xlu0 %329 }
  0x83   :  { %v489_v41 = vmul.f32 %v1410_v18, %v340_v9  ;;  %v487_v16 = vmul.f32 %v1406_v33, %v330_v25  ;;  %v1505_v25 = vld [vmem:[#allocation3 + $0x30] sm:$0xff]   ;;  %v2047_v15 = vadd.f32 %v773_v6, %v772_v27 }
  0x84   :  { %v1399_v11 = vunpack.c.h.bf16 %v1505_v25  ;;  %v1398_v17 = vunpack.c.l.bf16 %v1505_v25  ;;  %v1500_v25 = vld [vmem:[#allocation3 + $0x8] sm:$0xff]  }
  0x85   :  { %v1029_v37 = vadd.f32 1e-09, %v2047_v15 }
  0x86   :  { %186 = vmatpush.msra.mxu0 %v1399_v11  ;;  %v1418_v11 = vunpack.c.l.bf16 %v1509_v8 }
  0x87   :  { %1076 = vperm.xlu2 %1559, %v1025_v12  }
  0x88   :  { %1072 = vperm.xlu1 %1558, %v1024_v13   ;;  %1068 = vperm.xlu0 %1557, %v1023_v36   ;;  %v1504_v36 = vld [vmem:[#allocation3 + $0x28] sm:$0xff]  }
  0x89   :  { %v2043_v12 = vpop.permute.xlu2 %429  ;;  %187 = vmatpush.msra.mxu0 %v1398_v17  ;;  %v1394_v40 = vunpack.c.l.bf16 %v1504_v36 }
  0x8a   :  { %v345_v42 = vpop.permute.xlu1 %344  ;;  %v335_v44 = vpop.permute.xlu0 %334 }
  0x8b   :  { %v490_v43 = vmul.f32 %v1411_v26, %v345_v42  ;;  %v488_v46 = vmul.f32 %v1407_v28, %v335_v44  ;;  %v1395_v28 = vunpack.c.h.bf16 %v1504_v36  ;;  %v1028_v42 = vadd.f32 1e-09, %v2049_v35  ;;  %v1503_v44 = vld [vmem:[#allocation3 + $0x20] sm:$0xff]  }
  0x8c   :  { %v1391_v45 = vunpack.c.h.bf16 %v1503_v44 }
  0x8d   :  { %v526_v52 = vadd.f32 %v490_v43, %v489_v41  ;;  %v519_v60 = vadd.f32 %v488_v46, %v487_v16  ;;  %v1508_v41 = vld [vmem:[%s2437_s2 + $0x10] sm:$0xff]   ;;  %188 = vmatpush.msra.mxu0 %v1395_v28 }
  0x8e   :  { %v1527_v46 = vld [vmem:[#allocation6 + $0x30] sm:$0xff]   ;;  %v1415_v48 = vunpack.c.h.bf16 %v1508_v41 }
  0x8f   :  { %v527_v61 = vrot.slane %v526_v52, 4  ;;  %v520_v30 = vrot.slane %v519_v60, 4  ;;  %820 = vperm.xlu2 %1559, %v1967_v19   ;;  %v1027_v19 = vadd.f32 1e-09, %v2036_v57  ;;  %189 = vmatpush.msra.mxu0 %v1394_v40  ;;  %v1495_v22 = vunpack.c.h.bf16 %v1527_v46 }
  0x90   :  { %1080 = vperm.xlu1 %1558, %v1026_v47   ;;  %815 = vperm.xlu0 %1557, %v1940_v34   ;;  %v1414_v47 = vunpack.c.l.bf16 %v1508_v41  ;;  %v2089_v41 = vld [vmem:[#allocation6 + $0x10] sm:$0xff]  }
  0x91   :  { %v528_v56 = vadd.f32 %v527_v61, %v526_v52  ;;  %v521_v63 = vadd.f32 %v520_v30, %v519_v60  ;;  %v1390_v52 = vunpack.c.l.bf16 %v1503_v44  ;;  %v2064_v60 = vpop.permute.xlu2 %384  ;;  %190 = vmatpush.msra.mxu0 %v1391_v45  ;;  %v1502_v61 = vld [vmem:[#allocation3 + $0x18] sm:$0xff]   ;;  %v1510_v44 = vld [vmem:[%s2437_s2 + $0x20] sm:$0xff]  }
  0x92   :  { %v2038_v0 = vpop.permute.xlu1 %364  ;;  %v2040_v2 = vpop.permute.xlu0 %359  ;;  %v1387_v55 = vunpack.c.h.bf16 %v1502_v61  ;;  %v491_v62 = vmul.f32 %v1414_v47, %v1977_v21 }
  0x93   :  { %v529_v1 = vrot.slane %v528_v56, 2  ;;  %v522_v3 = vrot.slane %v521_v63, 2  ;;  %191 = vmatpush.msra.mxu0 %v1390_v52  ;;  %v1422_v52 = vunpack.c.l.bf16 %v1510_v44 }
  0x95   :  { %v530_v9 = vadd.f32 %v529_v1, %v528_v56  ;;  %v523_v34 = vadd.f32 %v522_v3, %v521_v63  ;;  %v1526_v56 = vld [vmem:[#allocation6 + $0x28] sm:$0xff]   ;;  %v1494_v63 = vunpack.c.l.bf16 %v1527_v46  ;;  %v1386_v1 = vunpack.c.l.bf16 %v1502_v61  ;;  %192 = vmatpush.msra.mxu0 %v1387_v55  ;;  %v1501_v3 = vld [vmem:[#allocation3 + $0x10] sm:$0xff]  }
  0x96   :  { %v1491_v20 = vunpack.c.h.bf16 %v1526_v56  ;;  %v1383_v6 = vunpack.c.h.bf16 %v1501_v3  ;;  %v2103_v46 = vld [vmem:[#allocation6 + $0x8] sm:$0xff]   ;;  %v1512_v55 = vld [vmem:[%s2437_s2 + $0x30] sm:$0xff]  }
  0x97   :  { %v531_v13 = vrot.slane %v530_v9, 1  ;;  %v524_v14 = vrot.slane %v523_v34, 1  ;;  %825 = vperm.xlu2 %1559, %v1964_v59   ;;  %v1528_v59 = vld [vmem:[#allocation6 + $0x38] sm:$0xff]   ;;  %193 = vmatpush.msra.mxu0 %v1386_v1 }
  0x98   :  { %810 = vperm.xlu1 %1558, %v1942_v38   ;;  %1084 = vperm.xlu0 %1557, %v1027_v19   ;;  %v1499_v43 = vunpack.c.h.bf16 %v1528_v59  ;;  %v1498_v16 = vunpack.c.l.bf16 %v1528_v59  ;;  %v1525_v19 = vld [vmem:[#allocation6 + $0x20] sm:$0xff]   ;;  %v493_v59 = vmul.f32 %v1418_v11, %v2040_v2 }
  0x99   :  { %v532_v18 = vadd.f32 %v531_v13, %v530_v9  ;;  %v525_v26 = vadd.f32 %v524_v14, %v523_v34  ;;  %v1490_v9 = vunpack.c.l.bf16 %v1526_v56  ;;  %v1487_v7 = vunpack.c.h.bf16 %v1525_v19  ;;  %194 = vmatpush.msra.mxu0 %v1383_v6  ;;  %v2080_v14 = vpop.permute.xlu2 %389  ;;  %v1515_v6 = vld [vmem:[%s2437_s2 + $0x48] sm:$0xff]  }
  0x9a   :  { %v2051_v31 = vpop.permute.xlu1 %419  ;;  %v2053_v33 = vpop.permute.xlu0 %414  ;;  %991 = vmatpush.msra.mxu1 %v1499_v43  ;;  %1529 = vmatpush.msra.mxu3 %v1499_v43  ;;  %v1419_v34 = vunpack.c.h.bf16 %v1509_v8  ;;  %v1430_v8 = vunpack.c.l.bf16 %v1512_v55  ;;  %v1443_v11 = vunpack.c.h.bf16 %v1515_v6 }
  0x9b   :  { %v2056_v38 = vsel %vm176_vm1, %v532_v18, %v525_v26  ;;  %v1486_v18 = vunpack.c.l.bf16 %v1525_v19  ;;  %v1373_v26 = vld [vmem:[#allocation3] sm:$0xff]  }
  0x9c   :  { %992 = vmatpush.msra.mxu1 %v1498_v16  ;;  %1530 = vmatpush.msra.mxu3 %v1498_v16  ;;  %v494_v28 = vmul.f32 %v1419_v34, %v2038_v0  ;;  %v1375_v40 = vunpack.c.h.bf16 %v1373_v26  ;;  %v1374_v0 = vunpack.c.l.bf16 %v1373_v26  ;;  %v1479_v16 = vunpack.c.h.bf16 %v2089_v41  ;;  %v2135_v34 = vld [vmem:[%s2437_s2 + $0x50] sm:$0xff]  }
  0x9e   :  { %993 = vmatpush.msra.mxu1 %v1495_v22  ;;  %1531 = vmatpush.msra.mxu3 %v1495_v22  ;;  %v540_v2 = vadd.f32 %v494_v28, %v493_v59  ;;  %v1478_v22 = vunpack.c.l.bf16 %v2089_v41  ;;  %v1446_v28 = vunpack.c.l.bf16 %v2135_v34 }
  0x9f   :  { %1092 = vperm.xlu2 %1559, %v1029_v37  }
  0xa0   :  { %830 = vperm.xlu1 %1558, %v1962_v58   ;;  %1088 = vperm.xlu0 %1557, %v1028_v42   ;;  %v492_v58 = vmul.f32 %v1415_v48, %v1997_v53  ;;  %v1382_v53 = vunpack.c.l.bf16 %v1501_v3  ;;  %v1423_v48 = vunpack.c.h.bf16 %v1510_v44  ;;  %v541_v61 = vrot.slane %v540_v2, 4  ;;  %v2120_v3 = vld [vmem:[#allocation6] sm:$0xff]  }
  0xa1   :  { %994 = vmatpush.msra.mxu1 %v1494_v63  ;;  %1532 = vmatpush.msra.mxu3 %v1494_v63  ;;  %v2108_v47 = vpop.permute.xlu2 %454  ;;  %v1514_v63 = vld [vmem:[%s2437_s2 + $0x40] sm:$0xff]   ;;  %v506_v44 = vmul.f32 %v1443_v11, %v2032_v49 }
  0xa2   :  { %v2066_v27 = vpop.permute.xlu1 %374  ;;  %v2068_v30 = vpop.permute.xlu0 %369  ;;  %v533_v21 = vadd.f32 %v492_v58, %v491_v62  ;;  %195 = vmatpush.msra.mxu0 %v1382_v53  ;;  %v1475_v62 = vunpack.c.h.bf16 %v2103_v46  ;;  %v1442_v53 = vunpack.c.l.bf16 %v1515_v6 }
  0xa3   :  { %995 = vmatpush.msra.mxu1 %v1491_v20  ;;  %1533 = vmatpush.msra.mxu3 %v1491_v20  ;;  %v1431_v20 = vunpack.c.h.bf16 %v1512_v55  ;;  %v495_v19 = vmul.f32 %v1422_v52, %v2068_v30  ;;  %v1447_v52 = vunpack.c.h.bf16 %v2135_v34 }
  0xa4   :  { %v534_v36 = vrot.slane %v533_v21, 4 }
  0xa5   :  { %996 = vmatpush.msra.mxu1 %v1490_v9  ;;  %1534 = vmatpush.msra.mxu3 %v1490_v9  ;;  %v496_v9 = vmul.f32 %v1423_v48, %v2066_v27 }
  0xa6   :  { %v535_v42 = vadd.f32 %v534_v36, %v533_v21  ;;  %v1474_v21 = vunpack.c.l.bf16 %v2103_v46  ;;  %v1439_v36 = vunpack.c.h.bf16 %v1514_v63 }
  0xa7   :  { %840 = vperm.xlu2 %1559, %v1999_v54   ;;  %v1379_v54 = vunpack.c.h.bf16 %v1500_v25  ;;  %997 = vmatpush.msra.mxu1 %v1487_v7  ;;  %v547_v26 = vadd.f32 %v496_v9, %v495_v19 }
  0xa8   :  { %835 = vperm.xlu1 %1558, %v1979_v23   ;;  %166 = vperm.xlu0 %1557, %v1981_v24   ;;  %v2084_v23 = vld [vmem:[#allocation6 + $0x18] sm:$0xff]   ;;  %v1378_v24 = vunpack.c.l.bf16 %v1500_v25  ;;  %v1438_v25 = vunpack.c.l.bf16 %v1514_v63 }
  0xa9   :  { %196 = vmatpush.msra.mxu0 %v1379_v54  ;;  %v1483_v37 = vunpack.c.h.bf16 %v2084_v23  ;;  %998 = vmatpush.msra.mxu1 %v1486_v18  ;;  %v1482_v43 = vunpack.c.l.bf16 %v2084_v23  ;;  %v499_v23 = vmul.f32 %v1430_v8, %v2080_v14  ;;  %v2158_v14 = vld [vmem:[%s2437_s2 + $0x38] sm:$0xff]   ;;  %v548_v48 = vrot.slane %v547_v26, 4 }
  0xaa   :  { %v2078_v13 = vpop.permute.xlu1 %379  ;;  %v2082_v17 = vpop.permute.xlu0 %434  ;;  %1535 = vmatpush.msra.mxu3 %v1487_v7  ;;  %v503_v41 = vmul.f32 %v1438_v25, %v2021_v10  ;;  %v1517_v10 = vld [vmem:[%s2437_s2 + $0x58] sm:$0xff]   ;;  %v1434_v49 = vunpack.c.l.bf16 %v2158_v14 }
  0xab   :  { %197 = vmatpush.msra.mxu0 %v1378_v24  ;;  %999 = vmatpush.msra.mxu1 %v1483_v37  ;;  %v2148_v24 = vld [vmem:[%s2437_s2 + $0x60] sm:$0xff]   ;;  %v1450_v6 = vunpack.c.l.bf16 %v1517_v10  ;;  %v549_v19 = vadd.f32 %v548_v48, %v547_v26 }
  0xac   :  { %1536 = vmatpush.msra.mxu3 %v1486_v18  ;;  %v1369_v18 = vld [vmem:[%s2435_s0] sm:$0xff]   ;;  %v1454_v8 = vunpack.c.l.bf16 %v2148_v24 }
  0xad   :  { %198 = vmatpush.msra.mxu0 %v1375_v40  ;;  %1000 = vmatpush.msra.mxu1 %v1482_v43 }
  0xae   :  { %1537 = vmatpush.msra.mxu3 %v1483_v37  ;;  %v505_v37 = vmul.f32 %v1442_v53, %v2051_v31  ;;  %v1455_v31 = vunpack.c.h.bf16 %v2148_v24 }
  0xaf   :  { %855 = vperm.xlu2 %1559, %v2016_v29   ;;  %199 = vmatpush.msra.mxu0 %v1374_v0  ;;  %v1371_v0 = vunpack.c.h.bf16 %v1369_v18 }
  0xb0   :  { %845 = vperm.xlu1 %1558, %v1995_v51   ;;  %161 = vperm.xlu0 %1557, %v1984_v32   ;;  %v536_v51 = vrot.slane %v535_v42, 2  ;;  %v1511_v32 = vld [vmem:[%s2437_s2 + $0x28] sm:$0xff]  }
  0xb1   :  { %v1426_v56 = vunpack.c.l.bf16 %v1511_v32  ;;  %1001 = vmatpush.msra.mxu1 %v1479_v16  ;;  %v1427_v1 = vunpack.c.h.bf16 %v1511_v32  ;;  %1538 = vmatpush.msra.mxu3 %v1482_v43  ;;  %v504_v32 = vmul.f32 %v1439_v36, %v2053_v33 }
  0xb2   :  { %v2098_v45 = vpop.permute.xlu1 %444  ;;  %v2101_v29 = vpop.permute.xlu0 %439  ;;  %v537_v58 = vadd.f32 %v536_v51, %v535_v42  ;;  %v1370_v51 = vunpack.c.l.bf16 %v1369_v18 }
  0xb3   :  { %1002 = vmatpush.msra.mxu1 %v1478_v22  ;;  %v498_v54 = vmul.f32 %v1427_v1, %v2064_v60  ;;  %1539 = vmatpush.msra.mxu3 %v1479_v16  ;;  %v1470_v60 = vunpack.c.l.bf16 %v2120_v3  ;;  %v400_v42 = vpop.permute.xlu2 %399  ;;  %v2168_v16 = vld [vmem:[%s2437_s2 + $0x68] sm:$0xff]   ;;  %v575_v9 = vadd.f32 %v504_v32, %v503_v41 }
  0xb4   :  { %v538_v30 = vrot.slane %v537_v58, 1  ;;  %v501_v24 = vmul.f32 %v1434_v49, %v400_v42 }
  0xb5   :  { %1003 = vmatpush.msra.mxu1 %v1475_v62  ;;  %1540 = vmatpush.msra.mxu3 %v1478_v22  ;;  %v2181_v22 = vld [vmem:[%s2437_s2 + $0x78] sm:$0xff]   ;;  %v576_v18 = vrot.slane %v575_v9, 4 }
  0xb7   :  { %865 = vperm.xlu2 %1559, %v2012_v4   ;;  %v542_v4 = vadd.f32 %v541_v61, %v540_v2  ;;  %1004 = vmatpush.msra.mxu1 %v1474_v21  ;;  %v539_v2 = vadd.f32 %v538_v30, %v537_v58  ;;  %v1451_v58 = vunpack.c.h.bf16 %v1517_v10 }
  0xb8   :  { %850 = vperm.xlu1 %1558, %v1993_v50   ;;  %860 = vperm.xlu0 %1557, %v2014_v5   ;;  %v497_v50 = vmul.f32 %v1426_v56, %v2078_v13  ;;  %v1471_v5 = vunpack.c.h.bf16 %v2120_v3  ;;  %v1459_v56 = vunpack.c.h.bf16 %v2168_v16 }
  0xb9   :  { %v543_v59 = vrot.slane %v542_v4, 2  ;;  %1541 = vmatpush.msra.mxu3 %v1475_v62  ;;  %v2196_v62 = vsel %vm924_vm2, %v539_v2, %v2056_v38  ;;  %v510_v11 = vmul.f32 %v1451_v58, %v2098_v45  ;;  %v577_v58 = vadd.f32 %v576_v18, %v575_v9 }
  0xba   :  { %v2130_v7 = vpop.permute.xlu1 %449  ;;  %v395_v27 = vpop.permute.xlu0 %394  ;;  %v554_v40 = vadd.f32 %v498_v54, %v497_v50  ;;  %1005 = vmatpush.msra.mxu1 %v1471_v5  ;;  %v509_v54 = vmul.f32 %v1450_v6, %v2101_v29 }
  0xbb   :  { %v500_v13 = vmul.f32 %v1431_v20, %v395_v27  ;;  %v2185_v61 = vadd.f32 %v543_v59, %v542_v4  ;;  %1542 = vmatpush.msra.mxu3 %v1474_v21  ;;  %v508_v27 = vmul.f32 %v1447_v52, %v2082_v17  ;;  %v1458_v21 = vunpack.c.l.bf16 %v2168_v16  ;;  %v465_v36 = vpop.permute.xlu2 %464 }
  0xbc   :  { %1006 = vmatpush.msra.mxu1 %v1470_v60  ;;  %v555_v55 = vrot.slane %v554_v40, 4  ;;  %v511_v3 = vmul.f32 %v1454_v8, %v2130_v7  ;;  %v512_v17 = vmul.f32 %v1455_v31, %v2108_v47  ;;  %v596_v41 = vadd.f32 %v510_v11, %v509_v54  ;;  %v1520_v7 = vld [vmem:[%s2437_s2 + $0x70] sm:$0xff]   ;;  %s1689_s2 = smov 128  }
  0xbd   :  { %v561_v43 = vadd.f32 %v500_v13, %v499_v23  ;;  %v545_v53 = vrot.slane %v2185_v61, 1  ;;  %1543 = vmatpush.msra.mxu3 %v1471_v5  ;;  %v1435_v13 = vunpack.c.h.bf16 %v2158_v14  ;;  %v550_v23 = vrot.slane %v549_v19, 2 }
  0xbe   :  { %v556_v25 = vadd.f32 %v555_v55, %v554_v40  ;;  %v603_v42 = vadd.f32 %v512_v17, %v511_v3  ;;  %v1463_v48 = vunpack.c.h.bf16 %v1520_v7  ;;  %v597_v52 = vrot.slane %v596_v41, 4 }
  0xbf   :  { %880 = vperm.xlu2 %1559, %v2049_v35   ;;  %v507_v35 = vmul.f32 %v1446_v28, %v2043_v12  ;;  %v562_v63 = vrot.slane %v561_v43, 4  ;;  %1544 = vmatpush.msra.mxu3 %v1470_v60  ;;  %v514_v60 = vmul.f32 %v1459_v56, %v465_v36  ;;  %v551_v47 = vadd.f32 %v550_v23, %v549_v19 }
  0xc0   :  { %875 = vperm.xlu1 %1558, %v2036_v57   ;;  %870 = vperm.xlu0 %1557, %v2029_v39   ;;  %v582_v57 = vadd.f32 %v506_v44, %v505_v37  ;;  %v1466_v39 = vunpack.c.l.bf16 %v2181_v22  ;;  %v557_v26 = vrot.slane %v556_v25, 2  ;;  %v1462_v55 = vunpack.c.l.bf16 %v1520_v7 }
  0xc1   :  { %v563_v30 = vadd.f32 %v562_v63, %v561_v43  ;;  %v589_v59 = vadd.f32 %v508_v27, %v507_v35  ;;  %v552_v63 = vrot.slane %v551_v47, 1  ;;  %v546_v19 = vadd.f32 %v545_v53, %v2185_v61 }
  0xc2   :  { %v95_v33 = vpop.permute.xlu1 %94  ;;  %v90_v20 = vpop.permute.xlu0 %89  ;;  %v583_v50 = vrot.slane %v582_v57, 4  ;;  %v558_v44 = vadd.f32 %v557_v26, %v556_v25  ;;  %v598_v27 = vadd.f32 %v597_v52, %v596_v41 }
  0xc3   :  { %v98_v1 = vmul.f32 %v1371_v0, %v95_v33  ;;  %v97_v12 = vmul.f32 %v1370_v51, %v90_v20  ;;  %v564_v29 = vrot.slane %v563_v30, 2  ;;  %v590_v51 = vrot.slane %v589_v59, 4 }
  0xc4   :  { %v553_v11 = vadd.f32 %v552_v63, %v551_v47  ;;  %v927_v61 = vsel %vm926_vm3, %v546_v19, %v2196_v62  ;;  %v599_v53 = vrot.slane %v598_v27, 2 }
  0xc5   :  { %v105_v4 = vrot.slane %v98_v1, 4  ;;  %v99_v34 = vrot.slane %v97_v12, 4  ;;  %v565_v32 = vadd.f32 %v564_v29, %v563_v30 }
  0xc7   :  { %v106_v46 = vadd.f32 %v105_v4, %v98_v1  ;;  %v100_v38 = vadd.f32 %v99_v34, %v97_v12  ;;  %v559_v1 = vrot.slane %v558_v44, 1  ;;  %v591_v4 = vadd.f32 %v590_v51, %v589_v59 }
  0xc8   :  { %885 = vperm.xlu0 %1557, %v2047_v15   ;;  %v584_v15 = vadd.f32 %v583_v50, %v582_v57  ;;  %v604_v57 = vrot.slane %v603_v42, 4  ;;  %v566_v50 = vrot.slane %v565_v32, 1  ;;  %v929_v59 = vsel %vm928_vm4, %v553_v11, %v927_v61 }
  0xc9   :  { %v107_v5 = vrot.slane %v106_v46, 2  ;;  %v101_v28 = vrot.slane %v100_v38, 2  ;;  %v592_v36 = vrot.slane %v591_v4, 2 }
  0xca   :  { %v460_v45 = vpop.permute.xlu1 %459  ;;  %v405_v14 = vpop.permute.xlu0 %404  ;;  %v585_v56 = vrot.slane %v584_v15, 2  ;;  %v605_v54 = vadd.f32 %v604_v57, %v603_v42  ;;  %v567_v3 = vadd.f32 %v566_v50, %v565_v32 }
  0xcb   :  { %v108_v37 = vadd.f32 %v107_v5, %v106_v46  ;;  %v513_v40 = vmul.f32 %v1458_v21, %v460_v45  ;;  %v102_v43 = vadd.f32 %v101_v28, %v100_v38  ;;  %v502_v0 = vmul.f32 %v1435_v13, %v405_v14  ;;  %v480_v5 = vpop.permute.xlu2 %479 }
  0xcc   :  { %v586_v46 = vadd.f32 %v585_v56, %v584_v15  ;;  %v578_v21 = vrot.slane %v577_v58, 2  ;;  %v560_v38 = vadd.f32 %v559_v1, %v558_v44  ;;  %v606_v45 = vrot.slane %v605_v54, 2 }
  0xcd   :  { %v109_v2 = vrot.slane %v108_v37, 1  ;;  %v103_v31 = vrot.slane %v102_v43, 1  ;;  %v610_v16 = vadd.f32 %v514_v60, %v513_v40  ;;  %v568_v10 = vadd.f32 %v502_v0, %v501_v24 }
  0xce   :  { %v1467_v24 = vunpack.c.h.bf16 %v2181_v22  ;;  %v579_v28 = vadd.f32 %v578_v21, %v577_v58  ;;  %v931_v14 = vsel %vm930_vm5, %v560_v38, %v929_v59  ;;  %v593_v60 = vadd.f32 %v592_v36, %v591_v4 }
  0xcf   :  { %v110_v49 = vadd.f32 %v109_v2, %v108_v37  ;;  %v569_v35 = vrot.slane %v568_v10, 4  ;;  %v104_v33 = vadd.f32 %v103_v31, %v102_v43  ;;  %v611_v20 = vrot.slane %v610_v16, 4 }
  0xd0   :  { %v517_v62 = vmul.f32 %v1466_v39, %v480_v5  ;;  %v933_v43 = vsel %vm932_vm6, %v567_v3, %v931_v14  ;;  %v600_v0 = vadd.f32 %v599_v53, %v598_v27  ;;  %v607_v42 = vadd.f32 %v606_v45, %v605_v54  ;;  %v1169_v53 = vld [vmem:[%s2444_s9 + $0x78] sm:$0xff]  ;;  %v1168_v5 = vld [vmem:[%s2444_s9 + $0x70] sm:$0xff] }
  0xd1   :  { %v570_v6 = vadd.f32 %v569_v35, %v568_v10  ;;  %v177_v12 = vsel %vm176_vm1, %v110_v49, %v104_v33  ;;  %v612_v13 = vadd.f32 %v611_v20, %v610_v16  ;;  %v587_v2 = vrot.slane %v586_v46, 1  ;;  %1174 = vmatpush.msra.mxu2 %v1169_v53  ;;  %v1165_v45 = vld [vmem:[%s2444_s9 + $0x58] sm:$0xff] }
  0xd2   :  { %v475_v8 = vpop.permute.xlu1 %474  ;;  %v470_v34 = vpop.permute.xlu0 %469  ;;  %200 = vmatmul.f32.vlgmr.msra.gmra.mxu0 %v177_v12  ;;  %v580_v44 = vrot.slane %v579_v28, 1  ;;  %v594_v10 = vrot.slane %v593_v60, 1  ;;  %v601_v32 = vrot.slane %v600_v0, 1  ;;  %v608_v22 = vrot.slane %v607_v42, 1 }
  0xd3   :  { %v516_v25 = vmul.f32 %v1463_v48, %v475_v8  ;;  %v571_v30 = vrot.slane %v570_v6, 2  ;;  %v515_v9 = vmul.f32 %v1462_v55, %v470_v34  ;;  %v613_v29 = vrot.slane %v612_v13, 2  ;;  %1175 = vmatpush.msra.mxu2 %v1168_v5 }
  0xd4   :  { %v588_v39 = vadd.f32 %v587_v2, %v586_v46  ;;  %v581_v49 = vadd.f32 %v580_v44, %v579_v28  ;;  %v595_v55 = vadd.f32 %v594_v10, %v593_v60  ;;  %v602_v56 = vadd.f32 %v601_v32, %v600_v0  ;;  %v1037_v46 = vpop.permute.xlu2 %1036  ;;  %v1166_v28 = vld [vmem:[%s2444_s9 + $0x60] sm:$0xff]  ;;  %v1161_v0 = vld [vmem:[%s2444_s9 + $0x38] sm:$0xff]  ;;  %v1159_v44 = vld [vmem:[%s2444_s9 + $0x28] sm:$0xff] }
  0xd5   :  { %v572_v18 = vadd.f32 %v571_v30, %v570_v6  ;;  %v617_v23 = vadd.f32 %v516_v25, %v515_v9  ;;  %v614_v31 = vadd.f32 %v613_v29, %v612_v13  ;;  %v609_v63 = vadd.f32 %v608_v22, %v607_v42  ;;  %v1164_v29 = vld [vmem:[%s2444_s9 + $0x50] sm:$0xff] }
  0xd6   :  { %v936_v57 = vsel %vm176_vm1, %v588_v39, %v581_v49  ;;  %v1160_v42 = vld [vmem:[%s2444_s9 + $0x30] sm:$0xff] }
  0xd7   :  { %v618_v17 = vrot.slane %v617_v23, 4  ;;  %v573_v26 = vrot.slane %v572_v18, 1  ;;  %v615_v52 = vrot.slane %v614_v31, 1  ;;  %v937_v8 = vsel %vm924_vm2, %v595_v55, %v936_v57  ;;  %v1156_v22 = vld [vmem:[%s2444_s9 + $0x10] sm:$0xff]  ;;  %v1154_v55 = vld [vmem:[%s2444_s9] sm:$0xff] }
  0xd8   :  { %v938_v19 = vsel %vm926_vm3, %v602_v56, %v937_v8  ;;  %v2311_v57 = vld [vmem:[%s2443_s8] ss:$0 sm:$0xff] }
  0xd9   :  { %v619_v37 = vadd.f32 %v618_v17, %v617_v23  ;;  %v574_v40 = vadd.f32 %v573_v26, %v572_v18  ;;  %v616_v1 = vadd.f32 %v615_v52, %v614_v31  ;;  %v939_v4 = vsel %vm928_vm4, %v609_v63, %v938_v19  ;;  %v1167_v26 = vld [vmem:[%s2444_s9 + $0x68] sm:$0xff]  ;;  %v1158_v31 = vld [vmem:[%s2444_s9 + $0x20] sm:$0xff] }
  0xda   :  { %v485_v41 = vpop.permute.xlu0 %484  ;;  %v1033_v30 = vpop.permute.xlu1 %1032  ;;  %1176 = vmatpush.msra.mxu2 %v1167_v26  ;;  %v1155_v52 = vld [vmem:[%s2444_s9 + $0x8] sm:$0xff] }
  0xdb   :  { %v620_v7 = vrot.slane %v619_v37, 2  ;;  %v518_v15 = vmul.f32 %v1467_v24, %v485_v41  ;;  %v935_v47 = vsel %vm934_vm7, %v574_v40, %v933_v43  ;;  %v940_v25 = vsel %vm930_vm5, %v616_v1, %v939_v4  ;;  %v1162_v43 = vld [vmem:[%s2444_s9 + $0x40] sm:$0xff] }
  0xdc   :  { %1007 = vmatmul.f32.vlgmr.msra.gmra.mxu1 %v935_v47  ;;  %v1049_v54 = vpop.permute.xlu2 %1048  ;;  %1177 = vmatpush.msra.mxu2 %v1166_v28  ;;  %v1094_v60 = vsel %vm176_vm1, %v1037_v46, %v1033_v30 }
  0xdd   :  { %v624_v16 = vadd.f32 %v518_v15, %v517_v62  ;;  %v621_v51 = vadd.f32 %v620_v7, %v619_v37  ;;  %v1163_v37 = vld [vmem:[%s2444_s9 + $0x48] sm:$0xff] }
  0xde   :  { %1178 = vmatpush.msra.mxu2 %v1165_v45 }
  0xdf   :  { %v625_v48 = vrot.slane %v624_v16, 4  ;;  %v622_v33 = vrot.slane %v621_v51, 1 }
  0xe0   :  { %1179 = vmatpush.msra.mxu2 %v1164_v29 }
  0xe1   :  { %v626_v35 = vadd.f32 %v625_v48, %v624_v16  ;;  %v623_v6 = vadd.f32 %v622_v33, %v621_v51  ;;  %v1157_v48 = vld [vmem:[%s2444_s9 + $0x18] sm:$0xff] }
  0xe2   :  { %v1041_v9 = vpop.permute.xlu0 %1040  ;;  %v1045_v21 = vpop.permute.xlu1 %1044  ;;  %1180 = vmatpush.msra.mxu2 %v1163_v37 }
  0xe3   :  { %v627_v58 = vrot.slane %v626_v35, 2  ;;  %v941_v34 = vsel %vm932_vm6, %v623_v6, %v940_v25  ;;  %v1095_v41 = vsel %vm924_vm2, %v1041_v9, %v1094_v60  ;;  %v1561_v25 = vld [vmem:[%s2441_s6] ss:$0 sm:$0xff] }
  0xe4   :  { %v1053_v18 = vpop.permute.xlu2 %1052  ;;  %1181 = vmatpush.msra.mxu2 %v1162_v43  ;;  %v1096_v7 = vsel %vm926_vm3, %v1045_v21, %v1095_v41 }
  0xe5   :  { %v628_v20 = vadd.f32 %v627_v58, %v626_v35  ;;  %v1097_v2 = vsel %vm928_vm4, %v1049_v54, %v1096_v7 }
  0xe6   :  { %1182 = vmatpush.msra.mxu2 %v1161_v0  ;;  %v1098_v10 = vsel %vm930_vm5, %v1053_v18, %v1097_v2 }
  0xe7   :  { %v629_v12 = vrot.slane %v628_v20, 1 }
  0xe8   :  { %1183 = vmatpush.msra.mxu2 %v1160_v42 }
  0xe9   :  { %v630_v50 = vadd.f32 %v629_v12, %v628_v20 }
  0xea   :  { %v209_v11 = vpop.permute.xlu0 %208  ;;  %v213_v38 = vpop.permute.xlu1 %212  ;;  %1184 = vmatpush.msra.mxu2 %v1159_v44 }
  0xeb   :  { %v942_v27 = vsel %vm934_vm7, %v630_v50, %v941_v34  ;;  %v2281_v16 = vsel %vm176_vm1, %v213_v38, %v209_v11 }
  0xec   :  { %1010 = vmatmul.f32.vlgmr.msra.gmra.mxu3 %v942_v27  ;;  %v1065_v3 = vpop.permute.xlu2 %1064  ;;  %1185 = vmatpush.msra.mxu2 %v1158_v31  ;;  %1564 = vrcp.f32 %v2281_v16  ;;  %vm221_vm9 = vweird.f32 %v2281_v16  ;;  %v225_v0 = vand.u32 2147483647, %v2281_v16 }
  0xee   :  { %1186 = vmatpush.msra.mxu2 %v1157_v48  ;;  %vm226_vm12 = vcmp.eq.f32.partialorder %v225_v0, 8.507059e+37 }
  0xf0   :  { %1187 = vmatpush.msra.mxu2 %v1156_v22 }
  0xf2   :  { %v1057_v13 = vpop.permute.xlu0 %1056  ;;  %v1061_v23 = vpop.permute.xlu1 %1060  ;;  %1188 = vmatpush.msra.mxu2 %v1155_v52 }
  0xf3   :  { %v1099_v32 = vsel %vm932_vm6, %v1057_v13, %v1098_v10  ;;  %v2302_v33 = vpop.eup %1564 }
  0xf4   :  { %v2240_v24 = vpop.permute.xlu2 %1076  ;;  %v2293_v39 = vsel %vm934_vm7, %v1061_v23, %v1099_v32  ;;  %1189 = vmatpush.msra.mxu2 %v1154_v55  ;;  %v217_v58 = vmul.f32 %v2302_v33, %v2281_v16  ;;  %vm222_vm8 = vweird.f32 %v2302_v33 }
  0xf5   :  { %1566 = vrcp.f32 %v2293_v39  ;;  %vm2347_vm10 = vmor %vm221_vm9, %vm222_vm8  ;;  %vm1115_vm13 = vweird.f32 %v2293_v39  ;;  %v1119_v22 = vand.u32 2147483647, %v2293_v39 }
  0xf6   :  { %v218_v6 = vsub.f32 1.0, %v217_v58 }
  0xf7   :  { %vm1120_vm15 = vcmp.eq.f32.partialorder %v1119_v22, 8.507059e+37 }
  0xf8   :  { %v219_v27 = vmul.f32 %v2302_v33, %v218_v6 }
  0xfa   :  { %v1069_v36 = vpop.permute.xlu0 %1068  ;;  %v2232_v61 = vpop.permute.xlu1 %1072 }
  0xfb   :  { %v2306_v63 = vpop.eup %1566  ;;  %v1101_v1 = vsel %vm176_vm1, %v1069_v36, %v1065_v3  ;;  %v227_v3 = vand.u32 2147483648, %v2281_v16 }
  0xfc   :  { %v821_v14 = vpop.permute.xlu2 %820  ;;  %v1111_v19 = vmul.f32 %v2306_v63, %v2293_v39  ;;  %v1102_v4 = vsel %vm924_vm2, %v2232_v61, %v1101_v1  ;;  %vm1116_vm11 = vweird.f32 %v2306_v63 }
  0xfd   :  { %v893_v34 = vmul.f32 %v2311_v57, %v821_v14  ;;  %v1103_v21 = vsel %vm926_vm3, %v2240_v24, %v1102_v4  ;;  %v228_v42 = vor.u32 1.1754944e-38, %v227_v3  ;;  %vm1117_vm14 = vmor %vm1115_vm13, %vm1116_vm11 }
  0xfe   :  { %v1112_v46 = vsub.f32 1.0, %v1111_v19 }
  0xff   :  { %v963_v36 = vrot.slane %v893_v34, 6 }
 0x100   :  { %v1113_v45 = vmul.f32 %v2306_v63, %v1112_v46 }
 0x102   :  { %v816_v17 = vpop.permute.xlu0 %815  ;;  %v2251_v59 = vpop.permute.xlu1 %1080  ;;  %v1114_v31 = vadd.f32 %v2306_v63, %v1113_v45 }
 0x103   :  { %v892_v12 = vmul.f32 %v2311_v57, %v816_v17  ;;  %v1104_v38 = vsel %vm928_vm4, %v2251_v59, %v1103_v21  ;;  %v220_v17 = vadd.f32 %v2302_v33, %v219_v27 }
 0x104   :  { %v826_v47 = vpop.permute.xlu2 %825  ;;  %v1118_v55 = vsel %vm1117_vm14, %v2306_v63, %v1114_v31 }
 0x105   :  { %v961_v30 = vrot.slane %v892_v12, 7  ;;  %v894_v9 = vmul.f32 %v2311_v57, %v826_v47  ;;  %v224_v47 = vsel %vm2347_vm10, %v2302_v33, %v220_v17 }
 0x107   :  { %v965_v59 = vrot.slane %v894_v9, 5 }
 0x10a   :  { %v2259_v40 = vpop.permute.xlu0 %1084  ;;  %v811_v62 = vpop.permute.xlu1 %810 }
 0x10b   :  { %v891_v50 = vmul.f32 %v2311_v57, %v811_v62  ;;  %v1105_v61 = vsel %vm930_vm5, %v2259_v40, %v1104_v38 }
 0x10c   :  { %v1093_v35 = vpop.permute.xlu2 %1092 }
 0x10d   :  { %v962_v13 = vsel %vm176_vm1, %v961_v30, %v891_v50 }
 0x10e   :  { %v964_v24 = vsel %vm924_vm2, %v963_v36, %v962_v13 }
 0x10f   :  { %v966_v7 = vsel %vm926_vm3, %v965_v59, %v964_v24 }
 0x112   :  { %v1089_v15 = vpop.permute.xlu0 %1088  ;;  %v831_v51 = vpop.permute.xlu1 %830 }
 0x113   :  { %v895_v11 = vmul.f32 %v2311_v57, %v831_v51  ;;  %v1106_v53 = vsel %vm932_vm6, %v1089_v15, %v1105_v61  ;;  %v1121_v51 = vand.u32 2147483648, %v2293_v39 }
 0x114   :  { %v841_v8 = vpop.permute.xlu2 %840  ;;  %v2345_v41 = vsel %vm934_vm7, %v1093_v35, %v1106_v53 }
 0x115   :  { %v967_v26 = vrot.slane %v895_v11, 4  ;;  %v897_v62 = vmul.f32 %v2311_v57, %v841_v8  ;;  %1568 = vrcp.f32 %v2345_v41  ;;  %v1122_v58 = vor.u32 1.1754944e-38, %v1121_v51 }
 0x117   :  { %v968_v2 = vsel %vm928_vm4, %v967_v26, %v966_v7  ;;  %v971_v32 = vrot.slane %v897_v62, 2  ;;  %v1123_v19 = vsel %vm1120_vm15, %v1122_v58, %v1118_v55  ;;  %v1214_v58 = vld [vmem:[%s2439_s4 + $0x8] sm:$0xff] }
 0x11a   :  { %v167_v49 = vpop.permute.xlu0 %166  ;;  %v836_v56 = vpop.permute.xlu1 %835 }
 0x11b   :  { %v896_v18 = vmul.f32 %v2311_v57, %v836_v56  ;;  %v173_v23 = vmul.f32 %v1561_v25, %v167_v49  ;;  %v229_v49 = vsel %vm226_vm12, %v228_v42, %v224_v47  ;;  %v1569_v6 = vpop.eup %1568 }
 0x11c   :  { %v856_v29 = vpop.permute.xlu2 %855  ;;  %v1126_v63 = vmul.f32 %v1569_v6, %v2345_v41  ;;  %vm1131_vm0 = vweird.f32 %v1569_v6 }
 0x11d   :  { %v969_v37 = vrot.slane %v896_v18, 3  ;;  %v181_v14 = vrot.slane %v173_v23, 7  ;;  %v900_v8 = vmul.f32 %v2311_v57, %v856_v29  ;;  %v1136_v29 = vand.u32 2147483648, %v2345_v41 }
 0x11f   :  { %v970_v16 = vsel %vm930_vm5, %v969_v37, %v968_v2  ;;  %v975_v27 = vrot.slane %v900_v8, 7  ;;  %v1137_v0 = vor.u32 1.1754944e-38, %v1136_v29 }
 0x120   :  { %v972_v35 = vsel %vm932_vm6, %v971_v32, %v970_v16  ;;  %v1563_v16 = vld [vmem:[%s2446_s11] ss:$0 sm:$0xff] }
 0x122   :  { %v162_v20 = vpop.permute.xlu0 %161  ;;  %v846_v54 = vpop.permute.xlu1 %845 }
 0x123   :  { %v172_v5 = vmul.f32 %v1561_v25, %v162_v20  ;;  %v898_v40 = vmul.f32 %v2311_v57, %v846_v54  ;;  %v1127_v54 = vsub.f32 1.0, %v1126_v63 }
 0x124   :  { %v866_v12 = vpop.permute.xlu2 %865 }
 0x125   :  { %v182_v15 = vsel %vm176_vm1, %v181_v14, %v172_v5  ;;  %v973_v10 = vrot.slane %v898_v40, 1  ;;  %v902_v21 = vmul.f32 %v2311_v57, %v866_v12  ;;  %v1128_v61 = vmul.f32 %v1569_v6, %v1127_v54 }
 0x126   :  { %v1134_v14 = vand.u32 2147483647, %v2345_v41  ;;  %v1227_v12 = vlaneseq }
 0x127   :  { %v974_v33 = vsel %vm934_vm7, %v973_v10, %v972_v35  ;;  %v979_v36 = vrot.slane %v902_v21, 5  ;;  %v1210_v35 = vstv %s2447_s12 }
 0x12a   :  { %v861_v28 = vpop.permute.xlu0 %860  ;;  %v851_v48 = vpop.permute.xlu1 %850 }
 0x12b   :  { %v901_v39 = vmul.f32 %v2311_v57, %v861_v28  ;;  %v899_v25 = vmul.f32 %v2311_v57, %v851_v48  ;;  %v1129_v28 = vadd.f32 %v1569_v6, %v1128_v61 }
 0x12c   :  { %v881_v3 = vpop.permute.xlu2 %880 }
 0x12d   :  { %v977_v30 = vrot.slane %v901_v39, 6  ;;  %v976_v11 = vsel %vm176_vm1, %v975_v27, %v899_v25  ;;  %v905_v24 = vmul.f32 %v2311_v57, %v881_v3 }
 0x12f   :  { %v978_v13 = vsel %vm924_vm2, %v977_v30, %v976_v11  ;;  %v985_v37 = vrot.slane %v905_v24, 2  ;;  %vm1130_vm2 = vweird.f32 %v2345_v41  ;;  %v1562_v41 = vld [vmem:[%s2445_s10] ss:$0 sm:$0xff] }
 0x130   :  { %v980_v5 = vsel %vm926_vm3, %v979_v36, %v978_v13  ;;  %vm1132_vm8 = vmor %vm1130_vm2, %vm1131_vm0  ;;  %vm1135_vm3 = vcmp.eq.f32.partialorder %v1134_v14, 8.507059e+37 }
 0x131   :  { %v1133_v62 = vsel %vm1132_vm8, %v1569_v6, %v1129_v28 }
 0x132   :  { %v871_v1 = vpop.permute.xlu0 %870  ;;  %v876_v9 = vpop.permute.xlu1 %875 }
 0x133   :  { %v903_v46 = vmul.f32 %v2311_v57, %v871_v1  ;;  %v904_v38 = vmul.f32 %v2311_v57, %v876_v9 }
 0x135   :  { %v981_v18 = vrot.slane %v903_v46, 4  ;;  %v983_v53 = vrot.slane %v904_v38, 3 }
 0x137   :  { %v982_v26 = vsel %vm928_vm4, %v981_v18, %v980_v5  ;;  %v1687_v18 = vmov 0.0  }
 0x138   :  { %v984_v59 = vsel %vm930_vm5, %v983_v53, %v982_v26  ;;  %vm1216_vm5 = vcmp.gt.f32.partialorder %v1214_v58, 0.0 }
 0x13a   :  { %v886_v23 = vpop.permute.xlu0 %885 }
 0x13b   :  { %v906_v17 = vmul.f32 %v2311_v57, %v886_v23 }
 0x13d   :  { %v987_v45 = vrot.slane %v906_v17, 1 }
 0x14f   :  { %v201_v60 = vpop.f32.mrf.mxu0 }
 0x150   :  { %v202_v44 = vadd.f32 %v201_v60, %v182_v15  ;;  %v986_v60 = vsel %vm932_vm6, %v985_v37, %v984_v59  ;;  %v1138_v15 = vsel %vm1135_vm3, %v1137_v0, %v1133_v62  ;;  %vm1233_vm6 = vcmask 58368  }
 0x151   :  { %v988_v57 = vsel %vm934_vm7, %v987_v45, %v986_v60  ;;  %vm1311_vm7 = vcmask 57344  }
 0x152   :  { %v230_v52 = vmul.f32 %v229_v49, %v202_v44 }
 0x154   :  { %v1142_v4 = vperm.slane %v230_v52, 0  ;;  %v1141_v40 = vrot.slane %v230_v52, 1  ;;  %v1213_v52 = vld [vmem:[%s2439_s4] sm:$0xff]  ;;  %s1688_s4 = smov [#allocation9]  }
 0x155   :  { %vm1215_vm4 = vcmp.gt.f32.partialorder %v1213_v52, 0.0  ;;  %s1345_s12 = sshll.u32 %s1688_s4, 4  ;;  %s1346_s12 = int_to_ptr.vmem [resolvable:$true] %s1345_s12 }
 0x156   :  { %v1143_v47 = vperm.slane %v1141_v40, 0  ;;  %v1366_v23 = vsel %vm1215_vm4, 1.0, %v1687_v18 }
 0x159   :  { %v1008_v56 = vpop.f32.mrf.mxu1 }
 0x15a   :  { %v1009_v20 = vadd.f32 %v1008_v56, %v974_v33 }
 0x15c   :  { %v1124_v50 = vmul.f32 %v1123_v19, %v1009_v20  ;;  %v2408_v19 = vand.u32 127, %v1227_v12 }
 0x15e   :  { %v2372_v34 = vmul.f32 %v1142_v4, %v1124_v50 }
 0x160   :  { %1148 = vst [vmem:[#allocation9] sm:$0xff] %v2372_v34  ;;  %1190 = vmatmul.f32.vlgmr.msra.gmra.mxu2 %v2372_v34 }
 0x16f   :  { %v1011_v43 = vpop.f32.mrf.mxu3 }
 0x170   :  { %v1012_v7 = vadd.f32 %v1011_v43, %v988_v57 }
 0x172   :  { %v1139_v42 = vmul.f32 %v1138_v15, %v1012_v7 }
 0x174   :  { %v1147_v2 = vmul.f32 %v1143_v47, %v1139_v42 }
 0x176   :  { %1149 = vst [vmem:[#allocation9 + $0x8] sm:$0xff] %v1147_v2  ;;  %1193 = vmatmul.f32.gmra.mxu2 %v1147_v2 }
 0x177   :  { %1353 = dma.vmem_to_hbm [thread:$0]  %s1346_s12, 256, %s1348_s28, [#allocation10], %s1689_s2, %s1689_s2, %s1690_s29  }
 0x1e3   :  { %v1191_v44 = vpop.f32.mrf.mxu2 }
 0x1e4   :  { %v1192_v31 = vadd.f32 %v1562_v41, %v1191_v44 }
 0x1e6   :  { %v1197_v10 = vmax.f32 %v1192_v31, 0.0 }
 0x1e8   :  { %v1203_v51 = vmul.f32 %v1563_v16, %v1197_v10 }
 0x1ea   :  { %1205 = vadd.xlane.f32.xlu1 %v1203_v51 }
 0x1f9   :  { %v1194_v32 = vpop.f32.mrf.mxu2 }
 0x1fa   :  { %v1195_v48 = vadd.f32 %v1562_v41, %v1194_v32 }
 0x1fc   :  { %v1198_v22 = vmax.f32 %v1195_v48, 0.0 }
 0x1fe   :  { %v1204_v49 = vmul.f32 %v1563_v16, %v1198_v22 }
 0x200   :  { %1207 = vadd.xlane.f32.xlu2 %v1204_v49 }
 0x25d   :  { %v1206_v55 = vpop.xlane.xlu1 %1205 }
 0x25e   :  { %v1211_v33 = vadd.f32 %v1210_v35, %v1206_v55 }
 0x260   :  { %v1217_v56 = vsel %vm1215_vm4, %v1211_v33, -1e+30 }
 0x261   :  { %1222 = vperm.xlu0 %1557, %v1217_v56  }
 0x273   :  { %v1208_v1 = vpop.xlane.xlu2 %1207 }
 0x274   :  { %v1212_v20 = vadd.f32 %v1210_v35, %v1208_v1 }
 0x276   :  { %v1218_v6 = vsel %vm1216_vm5, %v1212_v20, -1e+30 }
 0x277   :  { %1225 = vperm.xlu0 %1557, %v1218_v6  }
 0x2d3   :  { %v1223_v8 = vpop.permute.xlu0 %1222 }
 0x2d4   :  { %v1229_v4 = vperm.slane %v1223_v8, %v2408_v19 }
 0x2e9   :  { %v1226_v39 = vpop.permute.xlu0 %1225 }
 0x2ea   :  { %v1230_v50 = vperm.slane %v1226_v39, %v2408_v19 }
 0x2ec   :  { %v1231_v25 = vsel %vm176_vm1, %v1230_v50, %v1229_v4 }
 0x2ed   :  { %v1234_v63 = vsel %vm1233_vm6, %v1231_v25, -inf }
 0x2ee   :  { %1235 = vmax.xlane.f32.xlu0 %v1234_v63 }
 0x2f6   :  { %1150 = vadd.xlane.f32.xlu0 %v2372_v34  ;;  %v1367_v34 = vsel %vm1216_vm5, 1.0, %v1687_v18 }
 0x361   :  { %v1236_v27 = vpop.xlane.xlu0 %1235 }
 0x362   :  { %v1238_v30 = vperm.slane %v1236_v27, 0  ;;  %v1239_v9 = vperm.slane %v1236_v27, 1 }
 0x364   :  { %v1242_v46 = vsub.f32 %v1217_v56, %v1238_v30  ;;  %v1243_v21 = vsub.f32 %v1218_v6, %v1239_v9 }
 0x366   :  { %v1244_v11 = vmul.f32 1.442695, %v1242_v46  ;;  %v1246_v54 = vmul.f32 1.442695, %v1243_v21 }
 0x368   :  { %1570 = vpow2.f32 %v1244_v11 }
 0x369   :  { %1572 = vpow2.f32 %v1246_v54  ;;  %v1151_v38 = vpop.xlane.xlu0 %1150 }
 0x36a   :  { %v1307_v13 = vperm.slane %v1151_v38, %v2408_v19 }
 0x36c   :  { %1312 = vst.msk [vmem:[#allocation8] sm:$0x1] %vm1311_vm7, %v1307_v13 }
 0x36e   :  { %v1571_v36 = vpop.eup %1570 }
 0x36f   :  { %v1573_v3 = vpop.eup %1572  ;;  %v1252_v61 = vmul.f32 %v1571_v36, %v1366_v23 }
 0x370   :  { %v1253_v53 = vmul.f32 %v1573_v3, %v1367_v34 }
 0x371   :  { %1257 = vperm.xlu2 %1559, %v1252_v61  }
 0x372   :  { %1260 = vperm.xlu1 %1558, %v1253_v53  }
 0x39c   :  { %1152 = vadd.xlane.f32.xlu1 %v1147_v2 }
 0x3cb   :  { %v1258_v5 = vpop.permute.xlu2 %1257 }
 0x3cc   :  { %v1262_v24 = vperm.slane %v1258_v5, %v2408_v19 }
 0x3e4   :  { %v1261_v17 = vpop.permute.xlu1 %1260 }
 0x3e5   :  { %v1263_v26 = vperm.slane %v1261_v17, %v2408_v19 }
 0x3e7   :  { %v1264_v28 = vsel %vm176_vm1, %v1263_v26, %v1262_v24 }
 0x3e8   :  { %v1266_v45 = vsel %vm1233_vm6, %v1264_v28, 0.0 }
 0x3e9   :  { %1267 = vadd.xlane.f32.xlu2 %v1266_v45 }
 0x40f   :  { %v1153_v59 = vpop.xlane.xlu1 %1152 }
 0x410   :  { %v1308_v29 = vperm.slane %v1153_v59, %v2408_v19 }
 0x412   :  { %1313 = vst.msk [vmem:[#allocation8 + $0x2] sm:$0x1] %vm1311_vm7, %v1308_v29 }
 0x45c   :  { %v1268_v37 = vpop.xlane.xlu2 %1267 }
 0x45d   :  { %v1269_v14 = vadd.f32 1e-13, %v1268_v37 }
 0x45f   :  { %v1271_v40 = vperm.slane %v1269_v14, 0  ;;  %v1272_v60 = vperm.slane %v1269_v14, 1 }
 0x461   :  { %1574 = vrcp.f32 %v1271_v40  ;;  %v1286_v47 = vand.u32 2147483648, %v1271_v40  ;;  %v1284_v2 = vand.u32 2147483647, %v1271_v40  ;;  %vm1280_vm9 = vweird.f32 %v1271_v40 }
 0x462   :  { %1576 = vrcp.f32 %v1272_v60  ;;  %v1301_v32 = vand.u32 2147483648, %v1272_v60  ;;  %vm1295_vm13 = vweird.f32 %v1272_v60  ;;  %v1299_v22 = vand.u32 2147483647, %v1272_v60 }
 0x463   :  { %v1287_v31 = vor.u32 1.1754944e-38, %v1286_v47  ;;  %vm1285_vm11 = vcmp.eq.f32.partialorder %v1284_v2, 8.507059e+37 }
 0x464   :  { %v1302_v52 = vor.u32 1.1754944e-38, %v1301_v32  ;;  %vm1300_vm15 = vcmp.eq.f32.partialorder %v1299_v22, 8.507059e+37 }
 0x467   :  { %v1575_v62 = vpop.eup %1574 }
 0x468   :  { %v1577_v57 = vpop.eup %1576  ;;  %v1276_v43 = vmul.f32 %v1575_v62, %v1271_v40  ;;  %vm1281_vm1 = vweird.f32 %v1575_v62 }
 0x469   :  { %v1291_v0 = vmul.f32 %v1577_v57, %v1272_v60  ;;  %vm1282_vm10 = vmor %vm1280_vm9, %vm1281_vm1  ;;  %vm1296_vm12 = vweird.f32 %v1577_v57 }
 0x46a   :  { %v1277_v7 = vsub.f32 1.0, %v1276_v43  ;;  %vm1297_vm14 = vmor %vm1295_vm13, %vm1296_vm12 }
 0x46b   :  { %v1292_v15 = vsub.f32 1.0, %v1291_v0 }
 0x46c   :  { %v1278_v42 = vmul.f32 %v1575_v62, %v1277_v7 }
 0x46d   :  { %v1293_v41 = vmul.f32 %v1577_v57, %v1292_v15 }
 0x46e   :  { %v1279_v44 = vadd.f32 %v1575_v62, %v1278_v42 }
 0x46f   :  { %v1294_v10 = vadd.f32 %v1577_v57, %v1293_v41 }
 0x470   :  { %v1283_v16 = vsel %vm1282_vm10, %v1575_v62, %v1279_v44 }
 0x471   :  { %v1288_v51 = vsel %vm1285_vm11, %v1287_v31, %v1283_v16  ;;  %v1298_v49 = vsel %vm1297_vm14, %v1577_v57, %v1294_v10 }
 0x472   :  { %v1289_v48 = vmul.f32 %v1288_v51, %v1252_v61  ;;  %v1303_v35 = vsel %vm1300_vm15, %v1302_v52, %v1298_v49 }
 0x473   :  { %v1304_v55 = vmul.f32 %v1303_v35, %v1253_v53 }
 0x474   :  { %1317 = vperm.xlu0 %1557, %v1289_v48  }
 0x47c   :  { %1320 = vperm.xlu0 %1557, %v1304_v55  }
 0x4e6   :  { %v1318_v33 = vpop.permute.xlu0 %1317 }
 0x4e7   :  { %v1322_v56 = vperm.slane %v1318_v33, %v2408_v19 }
 0x4e9   :  { %1326 = vst.msk [vmem:[#allocation8 + $0x1] sm:$0x1] %vm1311_vm7, %v1322_v56 }
 0x4ee   :  { %v1321_v58 = vpop.permute.xlu0 %1320 }
 0x4ef   :  { %v1323_v1 = vperm.slane %v1321_v58, %v2408_v19 }
 0x4f1   :  { %1327 = vst.msk [vmem:[#allocation8 + $0x3] sm:$0x1] %vm1311_vm7, %v1323_v1 }
 0x4f2   :  { %1340 = dma.vmem_to_hbm [thread:$0]  %s1333_s15, 64, %s1335_s14, [#allocation5], %s1692_s18, %s1692_s18, %s1693_s19  }
 0x4f3   :  { %1678 = dma.done.wait [#allocation5], 64  }
 0x4f4   :  { %1679 = vsyncadd [#allocation5], 4294967232 }
 0x4f5   :  { %1680 = dma.done.wait [#allocation10], 256  }
 0x4f6   :  { %1681 = vsyncadd [#allocation10], 4294967040 }
 0x4f7   :  { %1362 = vsyncpa [#allocation4], 1 }
 0x4f8   :  { %1363 = vsyncpa [#allocation7], 1 }
 0x4f9   :  { %1364 = vsyncpa [#allocation5], 1 }
 0x4fa   :  { %1365 = vsyncpa [#allocation10], 1 }

</bundles_post_ra>
